<compile_context>
chip_gen: v7x
topology: tpu7x:2x2x1
jax: 0.10.0
libtpu: 0.0.40
codegen_flags: <defaults>
</compile_context>

<pallas_src>
import functools

import jax
import jax.numpy as jnp
from jax.experimental import pallas as pl
from jax.experimental.pallas import tpu as pltpu

BN_EPS = 1e-5


def _round_up(x, m):
    return (x + m - 1) // m * m


def _choose_tm(mp, max_tm=1024):
    """Largest row tile that is a multiple of 8, divides mp and is <= max_tm; prefer
    >= 2 grid steps so the parallel M axis can shard across v7x's two TensorCores."""
    best = mp
    for cand in range(8, min(mp, max_tm) + 1, 8):
        if mp % cand == 0:
            best = cand
    if best == mp and mp > 8:
        half = mp // 2
        if half % 8 == 0 and half <= max_tm:
            best = half
    return best


# ----------------------------- Pallas kernels -------------------------------

def _conv_pool_kernel(a_ref, w_ref, b_ref, o_ref, *, nq):
    """Fused im2col matmul + folded-BN bias + ReLU + nq-way max-pool epilogue.

    a_ref: (nq, TM, Kp) bf16 -- one im2col slab per pooling-window position.
    w_ref: (Kp, Np)     bf16 -- BN-folded conv weights.
    b_ref: (1, Np)      f32  -- BN-folded bias.
    o_ref: (TM, Np)     bf16 -- pooled activations.
    max_q(relu(acc_q + b)) == relu(max_q(acc_q) + b), so pool the raw accumulators.
    """
    acc = jnp.dot(a_ref[0], w_ref[...], preferred_element_type=jnp.float32)
    for q in range(1, nq):
        acc = jnp.maximum(
            acc, jnp.dot(a_ref[q], w_ref[...], preferred_element_type=jnp.float32))
    o_ref[...] = jnp.maximum(acc + b_ref[...], 0.0).astype(o_ref.dtype)


def _fc_tail_kernel(x_ref, w1_ref, b1_ref, w2_ref, b2_ref, o_ref):
    """Fused fc1 + ReLU + fc2; both weight matrices are VMEM resident."""
    h = jnp.dot(x_ref[...], w1_ref[...], preferred_element_type=jnp.float32)
    h = jnp.maximum(h + b1_ref[...], 0.0).astype(w2_ref.dtype)
    o = jnp.dot(h, w2_ref[...], preferred_element_type=jnp.float32)
    o_ref[...] = o + b2_ref[...]


# ------------------------------ layer wrappers -------------------------------

def im2col_pooled(x, k, stride, pad, ph, pw):
    """x: (B,H,W,C) -> (ph*pw, B*Hop*Wop, k*k*C) im2col slabs, one per pool position."""
    B, H, W, C = x.shape
    xp = jnp.pad(x, ((0, 0), (pad, pad), (pad, pad), (0, 0)))
    Ho = (H + 2 * pad - k) // stride + 1
    Wo = (W + 2 * pad - k) // stride + 1
    cols = []
    for i in range(k):
        for j in range(k):
            cols.append(xp[:, i:i + stride * Ho:stride, j:j + stride * Wo:stride, :])
    patches = jnp.concatenate(cols, axis=-1)        # (B, Ho, Wo, k*k*C), (kh, kw, C) order
    assert Ho % ph == 0 and Wo % pw == 0
    Hop, Wop = Ho // ph, Wo // pw
    quads = [patches[:, di::ph, dj::pw, :].reshape(B * Hop * Wop, k * k * C)
             for di in range(ph) for dj in range(pw)]
    return jnp.stack(quads, axis=0), Hop, Wop


def conv_bn_relu_pool(x, w_p, b_p, *, cout, k, stride, pad, ph=1, pw=1):
    """Conv2d + folded eval-mode BN + ReLU + (ph x pw) max pool, one Pallas call."""
    B = x.shape[0]
    quads, Hop, Wop = im2col_pooled(x, k, stride, pad, ph, pw)
    nq, Mq, K = quads.shape
    Kp, Np = w_p.shape
    Mqp = _round_up(Mq, 8)
    quads = jnp.pad(quads.astype(jnp.bfloat16), ((0, 0), (0, Mqp - Mq), (0, Kp - K)))
    TM = _choose_tm(Mqp)
    out = pl.pallas_call(
        functools.partial(_conv_pool_kernel, nq=nq),
        out_shape=jax.ShapeDtypeStruct((Mqp, Np), jnp.bfloat16),
        grid=(Mqp // TM,),
        in_specs=[
            pl.BlockSpec((nq, TM, Kp), lambda i: (0, i, 0)),
            pl.BlockSpec((Kp, Np), lambda i: (0, 0)),
            pl.BlockSpec((1, Np), lambda i: (0, 0)),
        ],
        out_specs=pl.BlockSpec((TM, Np), lambda i: (i, 0)),
        compiler_params=pltpu.CompilerParams(dimension_semantics=("parallel",)),
    )(quads, w_p, b_p)
    return out[:Mq, :cout].reshape(B, Hop, Wop, cout)


def fc_tail(x, w1_p, b1_p, w2_p, b2_p, *, n_actions):
    """Fused Linear + ReLU + Linear on an 8-row M tile (no 128-row padding waste)."""
    B, K1 = x.shape
    K1p, F1p = w1_p.shape
    Np2 = w2_p.shape[1]
    Mp = _round_up(B, 8)
    x_p = jnp.pad(x.astype(jnp.bfloat16), ((0, Mp - B), (0, K1p - K1)))
    out = pl.pallas_call(
        _fc_tail_kernel,
        out_shape=jax.ShapeDtypeStruct((Mp, Np2), jnp.float32),
        grid=(1,),
        in_specs=[
            pl.BlockSpec((Mp, K1p), lambda i: (0, 0)),
            pl.BlockSpec((K1p, F1p), lambda i: (0, 0)),
            pl.BlockSpec((1, F1p), lambda i: (0, 0)),
            pl.BlockSpec((F1p, Np2), lambda i: (0, 0)),
            pl.BlockSpec((1, Np2), lambda i: (0, 0)),
        ],
        out_specs=pl.BlockSpec((Mp, Np2), lambda i: (0, 0)),
        compiler_params=pltpu.CompilerParams(dimension_semantics=("arbitrary",)),
    )(x_p, w1_p, b1_p, w2_p, b2_p)
    return out[:B, :n_actions]


# ------------------------------ parameters ----------------------------------

def make_conv_bn_params(key, cin, cout, k):
    ks = jax.random.split(key, 6)
    return {
        "w": jax.random.normal(ks[0], (k, k, cin, cout), jnp.float32) * 0.05,
        "b": jax.random.normal(ks[1], (cout,), jnp.float32) * 0.05,
        "gamma": 1.0 + 0.1 * jax.random.normal(ks[2], (cout,), jnp.float32),
        "beta": 0.05 * jax.random.normal(ks[3], (cout,), jnp.float32),
        "mean": 0.05 * jax.random.normal(ks[4], (cout,), jnp.float32),
        "var": 0.5 + jax.random.uniform(ks[5], (cout,), jnp.float32),
    }


def make_params(key, in_channels, n_actions, filters, fcs):
    """Raw (PyTorch-style) parameters; BN unfolded, fc1 rows in NCHW-flatten order."""
    ks = jax.random.split(key, len(filters) + 2)
    params = {"initial": make_conv_bn_params(ks[0], in_channels, filters[0], 8),
              "blocks": []}
    for i in range(len(filters) - 1):
        params["blocks"].append(make_conv_bn_params(ks[1 + i], filters[i], filters[i + 1], 3))
    k_fc1, k_fc2 = jax.random.split(ks[-1])
    fc_in = 4 * 4 * filters[-1]                      # PyTorch Flatten of (C, 4, 4)
    params["fc1_w"] = jax.random.normal(k_fc1, (fc_in, fcs[0]), jnp.float32) * 0.02
    params["fc1_b"] = jnp.zeros((fcs[0],), jnp.float32)
    params["fc2_w"] = jax.random.normal(k_fc2, (fcs[0], n_actions), jnp.float32) * 0.02
    params["fc2_b"] = jnp.zeros((n_actions,), jnp.float32)
    return params


def prepare_params(params):
    """One-time inference prep: fold BN into the conv weights, pad to MXU tiles, cast
    to bf16, and permute fc1 rows so the runtime flatten can stay in (H, W, C) order."""
    def fold_conv(p):
        scale = p["gamma"] / jnp.sqrt(p["var"] + BN_EPS)               # (Cout,)
        w = (p["w"] * scale).reshape(-1, p["w"].shape[3])              # (k*k*Cin, Cout)
        b = (p["b"] - p["mean"]) * scale + p["beta"]
        K, N = w.shape
        Kp, Np = _round_up(K, 128), _round_up(N, 128)
        return {
            "w": jnp.pad(w, ((0, Kp - K), (0, Np - N))).astype(jnp.bfloat16),
            "b": jnp.pad(b.reshape(1, N), ((0, 0), (0, Np - N))).astype(jnp.float32),
        }

    prep = {"initial": fold_conv(params["initial"]),
            "blocks": [fold_conv(bp) for bp in params["blocks"]]}

    # fc1: PyTorch rows flatten (C, 4, 4); permute to (4, 4, C) flatten order.
    fc1_w = params["fc1_w"]
    C = fc1_w.shape[0] // 16
    F1 = fc1_w.shape[1]
    w1 = fc1_w.reshape(C, 4, 4, F1).transpose(1, 2, 0, 3).reshape(16 * C, F1)
    K1p, F1p = _round_up(16 * C, 128), _round_up(F1, 128)
    prep["fc1_w"] = jnp.pad(w1, ((0, K1p - 16 * C), (0, F1p - F1))).astype(jnp.bfloat16)
    prep["fc1_b"] = jnp.pad(params["fc1_b"].reshape(1, -1),
                            ((0, 0), (0, F1p - F1))).astype(jnp.float32)

    w2 = params["fc2_w"]
    NA = w2.shape[1]
    NAp = _round_up(NA, 128)
    prep["fc2_w"] = jnp.pad(w2, ((0, F1p - F1), (0, NAp - NA))).astype(jnp.bfloat16)
    prep["fc2_b"] = jnp.pad(params["fc2_b"].reshape(1, -1),
                            ((0, 0), (0, NAp - NA))).astype(jnp.float32)
    return prep


# ------------------------------ forward -------------------------------------

def cnn_policy_forward(prepared, state_nchw, *, filters, n_actions):
    x = jnp.transpose(state_nchw, (0, 2, 3, 1)).astype(jnp.bfloat16)   # NCHW -> NHWC
    # initial: ConvBn(in_channels, filters[0], 8, 4, 2), no pool
    x = conv_bn_relu_pool(x, prepared["initial"]["w"], prepared["initial"]["b"],
                          cout=filters[0], k=8, stride=4, pad=2, ph=1, pw=1)
    nb = len(prepared["blocks"])
    for bi, bp in enumerate(prepared["blocks"]):
        # ConvBn(filters[bi], filters[bi+1], pool=True) = conv3/s1/p1 + BN + ReLU + maxpool2
        Hc, Wc = x.shape[1], x.shape[2]            # 3x3 / s1 / p1 keeps spatial dims
        if bi == nb - 1:
            # Fold AdaptiveMaxPool2d((4,4)) into the last block's pool: the 2x2 pool
            # followed by a uniform adaptive pool equals one Hc/4 x Wc/4 pool.
            # TODO(synk): non-uniform adaptive-pool windows not implemented.
            assert Hc % 8 == 0 and Wc % 8 == 0
            ph, pw = Hc // 4, Wc // 4
        else:
            ph, pw = 2, 2
        x = conv_bn_relu_pool(x, bp["w"], bp["b"], cout=filters[bi + 1],
                              k=3, stride=1, pad=1, ph=ph, pw=pw)
    # x: (B, 4, 4, C); flatten in (H, W, C) order -- fc1 rows were pre-permuted to match
    # PyTorch's NCHW Flatten, so no runtime transpose is needed.
    B = x.shape[0]
    x = x.reshape(B, -1)
    return fc_tail(x, prepared["fc1_w"], prepared["fc1_b"],
                   prepared["fc2_w"], prepared["fc2_b"], n_actions=n_actions)


# TODO(synk): soft_update / target_network copy and the Adam optimizer are training
# machinery, not part of forward(); not implemented as kernels.
# TODO(synk): the im2col slabs for the 3x3 blocks are still built with XLA ops (now bf16
# and pool-fused); an in-kernel DMA patch gather would remove that HBM round trip.

if __name__ == "__main__":
    in_channels, n_actions = 4, 6
    filters, fcs = [16, 32, 64], [256]
    B, S = 2, 64   # 64 -> 16 (initial conv) -> 8 (block1 pool) -> 4x4 (block2 pool + adaptive)

    key = jax.random.PRNGKey(0)
    k_param, k_x = jax.random.split(key)
    params = make_params(k_param, in_channels, n_actions, filters, fcs)
    prepared = prepare_params(params)              # one-time BN fold / pad / bf16 cast
    state = jax.random.normal(k_x, (B, in_channels, S, S), jnp.float32)

    forward = jax.jit(functools.partial(
        cnn_policy_forward, filters=tuple(filters), n_actions=n_actions))
    q_values = forward(prepared, state)
    jax.block_until_ready(q_values)
    assert q_values.shape == (B, n_actions)
    print("KERNEL_OK")
</pallas_src>

<mosaic_0001>
module attributes {stable_mosaic.version = 11 : i64} {
  func.func @_conv_pool_kernel(%arg0: i32, %arg1: memref<1x256x256xbf16, #tpu.memory_space<vmem>>, %arg2: memref<256x128xbf16, #tpu.memory_space<vmem>>, %arg3: memref<1x128xf32, #tpu.memory_space<vmem>>, %arg4: memref<256x128xbf16, #tpu.memory_space<vmem>>) attributes {dimension_semantics = [#tpu.dimension_semantics<parallel>], iteration_bounds = array<i64: 2>, scalar_prefetch = 0 : i64, scratch_operands = 0 : i64, tpu.core_type = #tpu.core_type<tc>, window_params = [{transform_indices = @transform_0, window_bounds = array<i64: 1, 256, 256>}, {pipeline_mode = #tpu.pipeline_mode<synchronous>, transform_indices = @transform_1, window_bounds = array<i64: 256, 128>}, {pipeline_mode = #tpu.pipeline_mode<synchronous>, transform_indices = @transform_2, window_bounds = array<i64: 1, 128>}, {transform_indices = @transform_3, window_bounds = array<i64: 256, 128>}]} {
    %c0 = arith.constant 0 : index
    %c0_0 = arith.constant 0 : index
    %c0_1 = arith.constant 0 : index
    %0 = vector.load %arg1[%c0, %c0_0, %c0_1] : memref<1x256x256xbf16, #tpu.memory_space<vmem>>, vector<1x256x256xbf16>
    %1 = vector.shape_cast %0 : vector<1x256x256xbf16> to vector<256x256xbf16>
    %c0_2 = arith.constant 0 : index
    %c0_3 = arith.constant 0 : index
    %2 = vector.load %arg2[%c0_2, %c0_3] : memref<256x128xbf16, #tpu.memory_space<vmem>>, vector<256x128xbf16>
    %cst = arith.constant dense<0.000000e+00> : vector<256x128xf32>
    %3 = tpu.matmul %1, %2, %cst {dimension_numbers = #tpu.dot_dimension_numbers<[1], [0], [0], [1], [0, 0, 1, 1], [], []>} : vector<256x256xbf16>, vector<256x128xbf16>, vector<256x128xf32> -> vector<256x128xf32>
    %c0_4 = arith.constant 0 : index
    %c0_5 = arith.constant 0 : index
    %4 = vector.load %arg3[%c0_4, %c0_5] : memref<1x128xf32, #tpu.memory_space<vmem>>, vector<1x128xf32>
    %5 = vector.broadcast %4 : vector<1x128xf32> to vector<256x128xf32>
    %6 = arith.addf %3, %5 : vector<256x128xf32>
    %cst_6 = arith.constant 0.000000e+00 : f32
    %7 = vector.broadcast %cst_6 : f32 to vector<256x128xf32>
    %8 = arith.maximumf %6, %7 : vector<256x128xf32>
    %9 = arith.truncf %8 : vector<256x128xf32> to vector<256x128xbf16>
    %c0_7 = arith.constant 0 : index
    %c0_8 = arith.constant 0 : index
    %10 = vector.load %arg4[%c0_7, %c0_8] : memref<256x128xbf16, #tpu.memory_space<vmem>>, vector<256x128xbf16>
    tpu.vector_store %arg4[%c0_7, %c0_8], %9 {strides = array<i32>} : memref<256x128xbf16, #tpu.memory_space<vmem>>, vector<256x128xbf16>,
    return
  }
  func.func @transform_0(%arg0: i32) -> (i32, i32, i32) {
    %c0_i32 = arith.constant 0 : i32
    %c0_i32_0 = arith.constant 0 : i32
    %c0_i32_1 = arith.constant 0 : i32
    return %c0_i32, %arg0, %c0_i32_0 : i32, i32, i32
  }
  func.func @transform_1(%arg0: i32) -> (i32, i32) {
    %c0_i32 = arith.constant 0 : i32
    %c0_i32_0 = arith.constant 0 : i32
    %c0_i32_1 = arith.constant 0 : i32
    return %c0_i32, %c0_i32_0 : i32, i32
  }
  func.func @transform_2(%arg0: i32) -> (i32, i32) {
    %c0_i32 = arith.constant 0 : i32
    %c0_i32_0 = arith.constant 0 : i32
    %c0_i32_1 = arith.constant 0 : i32
    return %c0_i32, %c0_i32_0 : i32, i32
  }
  func.func @transform_3(%arg0: i32) -> (i32, i32) {
    %c0_i32 = arith.constant 0 : i32
    %c0_i32_0 = arith.constant 0 : i32
    return %arg0, %c0_i32 : i32, i32
  }
}

module attributes {stable_mosaic.version = 11 : i64} {
  func.func @_conv_pool_kernel(%arg0: i32, %arg1: memref<4x64x256xbf16, #tpu.memory_space<vmem>>, %arg2: memref<256x128xbf16, #tpu.memory_space<vmem>>, %arg3: memref<1x128xf32, #tpu.memory_space<vmem>>, %arg4: memref<64x128xbf16, #tpu.memory_space<vmem>>) attributes {dimension_semantics = [#tpu.dimension_semantics<parallel>], iteration_bounds = array<i64: 2>, scalar_prefetch = 0 : i64, scratch_operands = 0 : i64, tpu.core_type = #tpu.core_type<tc>, window_params = [{transform_indices = @transform_0, window_bounds = array<i64: 4, 64, 256>}, {pipeline_mode = #tpu.pipeline_mode<synchronous>, transform_indices = @transform_1, window_bounds = array<i64: 256, 128>}, {pipeline_mode = #tpu.pipeline_mode<synchronous>, transform_indices = @transform_2, window_bounds = array<i64: 1, 128>}, {transform_indices = @transform_3, window_bounds = array<i64: 64, 128>}]} {
    %c0 = arith.constant 0 : index
    %c0_0 = arith.constant 0 : index
    %c0_1 = arith.constant 0 : index
    %0 = vector.load %arg1[%c0, %c0_0, %c0_1] : memref<4x64x256xbf16, #tpu.memory_space<vmem>>, vector<1x64x256xbf16>
    %1 = vector.shape_cast %0 : vector<1x64x256xbf16> to vector<64x256xbf16>
    %c0_2 = arith.constant 0 : index
    %c0_3 = arith.constant 0 : index
    %2 = vector.load %arg2[%c0_2, %c0_3] : memref<256x128xbf16, #tpu.memory_space<vmem>>, vector<256x128xbf16>
    %cst = arith.constant dense<0.000000e+00> : vector<64x128xf32>
    %3 = tpu.matmul %1, %2, %cst {dimension_numbers = #tpu.dot_dimension_numbers<[1], [0], [0], [1], [0, 0, 1, 1], [], []>} : vector<64x256xbf16>, vector<256x128xbf16>, vector<64x128xf32> -> vector<64x128xf32>
    %c1 = arith.constant 1 : index
    %c0_4 = arith.constant 0 : index
    %c0_5 = arith.constant 0 : index
    %4 = vector.load %arg1[%c1, %c0_4, %c0_5] : memref<4x64x256xbf16, #tpu.memory_space<vmem>>, vector<1x64x256xbf16>
    %5 = vector.shape_cast %4 : vector<1x64x256xbf16> to vector<64x256xbf16>
    %c0_6 = arith.constant 0 : index
    %c0_7 = arith.constant 0 : index
    %6 = vector.load %arg2[%c0_6, %c0_7] : memref<256x128xbf16, #tpu.memory_space<vmem>>, vector<256x128xbf16>
    %cst_8 = arith.constant dense<0.000000e+00> : vector<64x128xf32>
    %7 = tpu.matmul %5, %6, %cst_8 {dimension_numbers = #tpu.dot_dimension_numbers<[1], [0], [0], [1], [0, 0, 1, 1], [], []>} : vector<64x256xbf16>, vector<256x128xbf16>, vector<64x128xf32> -> vector<64x128xf32>
    %8 = arith.maximumf %3, %7 : vector<64x128xf32>
    %c2 = arith.constant 2 : index
    %c0_9 = arith.constant 0 : index
    %c0_10 = arith.constant 0 : index
    %9 = vector.load %arg1[%c2, %c0_9, %c0_10] : memref<4x64x256xbf16, #tpu.memory_space<vmem>>, vector<1x64x256xbf16>
    %10 = vector.shape_cast %9 : vector<1x64x256xbf16> to vector<64x256xbf16>
    %c0_11 = arith.constant 0 : index
    %c0_12 = arith.constant 0 : index
    %11 = vector.load %arg2[%c0_11, %c0_12] : memref<256x128xbf16, #tpu.memory_space<vmem>>, vector<256x128xbf16>
    %cst_13 = arith.constant dense<0.000000e+00> : vector<64x128xf32>
    %12 = tpu.matmul %10, %11, %cst_13 {dimension_numbers = #tpu.dot_dimension_numbers<[1], [0], [0], [1], [0, 0, 1, 1], [], []>} : vector<64x256xbf16>, vector<256x128xbf16>, vector<64x128xf32> -> vector<64x128xf32>
    %13 = arith.maximumf %8, %12 : vector<64x128xf32>
    %c3 = arith.constant 3 : index
    %c0_14 = arith.constant 0 : index
    %c0_15 = arith.constant 0 : index
    %14 = vector.load %arg1[%c3, %c0_14, %c0_15] : memref<4x64x256xbf16, #tpu.memory_space<vmem>>, vector<1x64x256xbf16>
    %15 = vector.shape_cast %14 : vector<1x64x256xbf16> to vector<64x256xbf16>
    %c0_16 = arith.constant 0 : index
    %c0_17 = arith.constant 0 : index
    %16 = vector.load %arg2[%c0_16, %c0_17] : memref<256x128xbf16, #tpu.memory_space<vmem>>, vector<256x128xbf16>
    %cst_18 = arith.constant dense<0.000000e+00> : vector<64x128xf32>
    %17 = tpu.matmul %15, %16, %cst_18 {dimension_numbers = #tpu.dot_dimension_numbers<[1], [0], [0], [1], [0, 0, 1, 1], [], []>} : vector<64x256xbf16>, vector<256x128xbf16>, vector<64x128xf32> -> vector<64x128xf32>
    %18 = arith.maximumf %13, %17 : vector<64x128xf32>
    %c0_19 = arith.constant 0 : index
    %c0_20 = arith.constant 0 : index
    %19 = vector.load %arg3[%c0_19, %c0_20] : memref<1x128xf32, #tpu.memory_space<vmem>>, vector<1x128xf32>
    %20 = vector.broadcast %19 : vector<1x128xf32> to vector<64x128xf32>
    %21 = arith.addf %18, %20 : vector<64x128xf32>
    %cst_21 = arith.constant 0.000000e+00 : f32
    %22 = vector.broadcast %cst_21 : f32 to vector<64x128xf32>
    %23 = arith.maximumf %21, %22 : vector<64x128xf32>
    %24 = arith.truncf %23 : vector<64x128xf32> to vector<64x128xbf16>
    %c0_22 = arith.constant 0 : index
    %c0_23 = arith.constant 0 : index
    %25 = vector.load %arg4[%c0_22, %c0_23] : memref<64x128xbf16, #tpu.memory_space<vmem>>, vector<64x128xbf16>
    tpu.vector_store %arg4[%c0_22, %c0_23], %24 {strides = array<i32>} : memref<64x128xbf16, #tpu.memory_space<vmem>>, vector<64x128xbf16>,
    return
  }
  func.func @transform_0(%arg0: i32) -> (i32, i32, i32) {
    %c0_i32 = arith.constant 0 : i32
    %c0_i32_0 = arith.constant 0 : i32
    %c0_i32_1 = arith.constant 0 : i32
    return %c0_i32, %arg0, %c0_i32_0 : i32, i32, i32
  }
  func.func @transform_1(%arg0: i32) -> (i32, i32) {
    %c0_i32 = arith.constant 0 : i32
    %c0_i32_0 = arith.constant 0 : i32
    %c0_i32_1 = arith.constant 0 : i32
    return %c0_i32, %c0_i32_0 : i32, i32
  }
  func.func @transform_2(%arg0: i32) -> (i32, i32) {
    %c0_i32 = arith.constant 0 : i32
    %c0_i32_0 = arith.constant 0 : i32
    %c0_i32_1 = arith.constant 0 : i32
    return %c0_i32, %c0_i32_0 : i32, i32
  }
  func.func @transform_3(%arg0: i32) -> (i32, i32) {
    %c0_i32 = arith.constant 0 : i32
    %c0_i32_0 = arith.constant 0 : i32
    return %arg0, %c0_i32 : i32, i32
  }
}

module attributes {stable_mosaic.version = 11 : i64} {
  func.func @_conv_pool_kernel(%arg0: i32, %arg1: memref<4x16x384xbf16, #tpu.memory_space<vmem>>, %arg2: memref<384x128xbf16, #tpu.memory_space<vmem>>, %arg3: memref<1x128xf32, #tpu.memory_space<vmem>>, %arg4: memref<16x128xbf16, #tpu.memory_space<vmem>>) attributes {dimension_semantics = [#tpu.dimension_semantics<parallel>], iteration_bounds = array<i64: 2>, scalar_prefetch = 0 : i64, scratch_operands = 0 : i64, tpu.core_type = #tpu.core_type<tc>, window_params = [{transform_indices = @transform_0, window_bounds = array<i64: 4, 16, 384>}, {pipeline_mode = #tpu.pipeline_mode<synchronous>, transform_indices = @transform_1, window_bounds = array<i64: 384, 128>}, {pipeline_mode = #tpu.pipeline_mode<synchronous>, transform_indices = @transform_2, window_bounds = array<i64: 1, 128>}, {transform_indices = @transform_3, window_bounds = array<i64: 16, 128>}]} {
    %c0 = arith.constant 0 : index
    %c0_0 = arith.constant 0 : index
    %c0_1 = arith.constant 0 : index
    %0 = vector.load %arg1[%c0, %c0_0, %c0_1] : memref<4x16x384xbf16, #tpu.memory_space<vmem>>, vector<1x16x384xbf16>
    %1 = vector.shape_cast %0 : vector<1x16x384xbf16> to vector<16x384xbf16>
    %c0_2 = arith.constant 0 : index
    %c0_3 = arith.constant 0 : index
    %2 = vector.load %arg2[%c0_2, %c0_3] : memref<384x128xbf16, #tpu.memory_space<vmem>>, vector<384x128xbf16>
    %cst = arith.constant dense<0.000000e+00> : vector<16x128xf32>
    %3 = tpu.matmul %1, %2, %cst {dimension_numbers = #tpu.dot_dimension_numbers<[1], [0], [0], [1], [0, 0, 1, 1], [], []>} : vector<16x384xbf16>, vector<384x128xbf16>, vector<16x128xf32> -> vector<16x128xf32>
    %c1 = arith.constant 1 : index
    %c0_4 = arith.constant 0 : index
    %c0_5 = arith.constant 0 : index
    %4 = vector.load %arg1[%c1, %c0_4, %c0_5] : memref<4x16x384xbf16, #tpu.memory_space<vmem>>, vector<1x16x384xbf16>
    %5 = vector.shape_cast %4 : vector<1x16x384xbf16> to vector<16x384xbf16>
    %c0_6 = arith.constant 0 : index
    %c0_7 = arith.constant 0 : index
    %6 = vector.load %arg2[%c0_6, %c0_7] : memref<384x128xbf16, #tpu.memory_space<vmem>>, vector<384x128xbf16>
    %cst_8 = arith.constant dense<0.000000e+00> : vector<16x128xf32>
    %7 = tpu.matmul %5, %6, %cst_8 {dimension_numbers = #tpu.dot_dimension_numbers<[1], [0], [0], [1], [0, 0, 1, 1], [], []>} : vector<16x384xbf16>, vector<384x128xbf16>, vector<16x128xf32> -> vector<16x128xf32>
    %8 = arith.maximumf %3, %7 : vector<16x128xf32>
    %c2 = arith.constant 2 : index
    %c0_9 = arith.constant 0 : index
    %c0_10 = arith.constant 0 : index
    %9 = vector.load %arg1[%c2, %c0_9, %c0_10] : memref<4x16x384xbf16, #tpu.memory_space<vmem>>, vector<1x16x384xbf16>
    %10 = vector.shape_cast %9 : vector<1x16x384xbf16> to vector<16x384xbf16>
    %c0_11 = arith.constant 0 : index
    %c0_12 = arith.constant 0 : index
    %11 = vector.load %arg2[%c0_11, %c0_12] : memref<384x128xbf16, #tpu.memory_space<vmem>>, vector<384x128xbf16>
    %cst_13 = arith.constant dense<0.000000e+00> : vector<16x128xf32>
    %12 = tpu.matmul %10, %11, %cst_13 {dimension_numbers = #tpu.dot_dimension_numbers<[1], [0], [0], [1], [0, 0, 1, 1], [], []>} : vector<16x384xbf16>, vector<384x128xbf16>, vector<16x128xf32> -> vector<16x128xf32>
    %13 = arith.maximumf %8, %12 : vector<16x128xf32>
    %c3 = arith.constant 3 : index
    %c0_14 = arith.constant 0 : index
    %c0_15 = arith.constant 0 : index
    %14 = vector.load %arg1[%c3, %c0_14, %c0_15] : memref<4x16x384xbf16, #tpu.memory_space<vmem>>, vector<1x16x384xbf16>
    %15 = vector.shape_cast %14 : vector<1x16x384xbf16> to vector<16x384xbf16>
    %c0_16 = arith.constant 0 : index
    %c0_17 = arith.constant 0 : index
    %16 = vector.load %arg2[%c0_16, %c0_17] : memref<384x128xbf16, #tpu.memory_space<vmem>>, vector<384x128xbf16>
    %cst_18 = arith.constant dense<0.000000e+00> : vector<16x128xf32>
    %17 = tpu.matmul %15, %16, %cst_18 {dimension_numbers = #tpu.dot_dimension_numbers<[1], [0], [0], [1], [0, 0, 1, 1], [], []>} : vector<16x384xbf16>, vector<384x128xbf16>, vector<16x128xf32> -> vector<16x128xf32>
    %18 = arith.maximumf %13, %17 : vector<16x128xf32>
    %c0_19 = arith.constant 0 : index
    %c0_20 = arith.constant 0 : index
    %19 = vector.load %arg3[%c0_19, %c0_20] : memref<1x128xf32, #tpu.memory_space<vmem>>, vector<1x128xf32>
    %20 = vector.broadcast %19 : vector<1x128xf32> to vector<16x128xf32>
    %21 = arith.addf %18, %20 : vector<16x128xf32>
    %cst_21 = arith.constant 0.000000e+00 : f32
    %22 = vector.broadcast %cst_21 : f32 to vector<16x128xf32>
    %23 = arith.maximumf %21, %22 : vector<16x128xf32>
    %24 = arith.truncf %23 : vector<16x128xf32> to vector<16x128xbf16>
    %c0_22 = arith.constant 0 : index
    %c0_23 = arith.constant 0 : index
    %25 = vector.load %arg4[%c0_22, %c0_23] : memref<16x128xbf16, #tpu.memory_space<vmem>>, vector<16x128xbf16>
    tpu.vector_store %arg4[%c0_22, %c0_23], %24 {strides = array<i32>} : memref<16x128xbf16, #tpu.memory_space<vmem>>, vector<16x128xbf16>,
    return
  }
  func.func @transform_0(%arg0: i32) -> (i32, i32, i32) {
    %c0_i32 = arith.constant 0 : i32
    %c0_i32_0 = arith.constant 0 : i32
    %c0_i32_1 = arith.constant 0 : i32
    return %c0_i32, %arg0, %c0_i32_0 : i32, i32, i32
  }
  func.func @transform_1(%arg0: i32) -> (i32, i32) {
    %c0_i32 = arith.constant 0 : i32
    %c0_i32_0 = arith.constant 0 : i32
    %c0_i32_1 = arith.constant 0 : i32
    return %c0_i32, %c0_i32_0 : i32, i32
  }
  func.func @transform_2(%arg0: i32) -> (i32, i32) {
    %c0_i32 = arith.constant 0 : i32
    %c0_i32_0 = arith.constant 0 : i32
    %c0_i32_1 = arith.constant 0 : i32
    return %c0_i32, %c0_i32_0 : i32, i32
  }
  func.func @transform_3(%arg0: i32) -> (i32, i32) {
    %c0_i32 = arith.constant 0 : i32
    %c0_i32_0 = arith.constant 0 : i32
    return %arg0, %c0_i32 : i32, i32
  }
}

module attributes {stable_mosaic.version = 11 : i64} {
  func.func @_fc_tail_kernel(%arg0: i32, %arg1: memref<8x1024xbf16, #tpu.memory_space<vmem>>, %arg2: memref<1024x256xbf16, #tpu.memory_space<vmem>>, %arg3: memref<1x256xf32, #tpu.memory_space<vmem>>, %arg4: memref<256x128xbf16, #tpu.memory_space<vmem>>, %arg5: memref<1x128xf32, #tpu.memory_space<vmem>>, %arg6: memref<8x128xf32, #tpu.memory_space<vmem>>) attributes {dimension_semantics = [#tpu.dimension_semantics<arbitrary>], iteration_bounds = array<i64: 1>, scalar_prefetch = 0 : i64, scratch_operands = 0 : i64, tpu.core_type = #tpu.core_type<tc>, window_params = [{pipeline_mode = #tpu.pipeline_mode<synchronous>, transform_indices = @transform_0, window_bounds = array<i64: 8, 1024>}, {pipeline_mode = #tpu.pipeline_mode<synchronous>, transform_indices = @transform_1, window_bounds = array<i64: 1024, 256>}, {pipeline_mode = #tpu.pipeline_mode<synchronous>, transform_indices = @transform_2, window_bounds = array<i64: 1, 256>}, {pipeline_mode = #tpu.pipeline_mode<synchronous>, transform_indices = @transform_3, window_bounds = array<i64: 256, 128>}, {pipeline_mode = #tpu.pipeline_mode<synchronous>, transform_indices = @transform_4, window_bounds = array<i64: 1, 128>}, {pipeline_mode = #tpu.pipeline_mode<synchronous>, transform_indices = @transform_5, window_bounds = array<i64: 8, 128>}]} {
    %c0 = arith.constant 0 : index
    %c0_0 = arith.constant 0 : index
    %0 = vector.load %arg1[%c0, %c0_0] : memref<8x1024xbf16, #tpu.memory_space<vmem>>, vector<8x1024xbf16>
    %c0_1 = arith.constant 0 : index
    %c0_2 = arith.constant 0 : index
    %1 = vector.load %arg2[%c0_1, %c0_2] : memref<1024x256xbf16, #tpu.memory_space<vmem>>, vector<1024x256xbf16>
    %cst = arith.constant dense<0.000000e+00> : vector<8x256xf32>
    %2 = tpu.matmul %0, %1, %cst {dimension_numbers = #tpu.dot_dimension_numbers<[1], [0], [0], [1], [0, 0, 1, 1], [], []>} : vector<8x1024xbf16>, vector<1024x256xbf16>, vector<8x256xf32> -> vector<8x256xf32>
    %c0_3 = arith.constant 0 : index
    %c0_4 = arith.constant 0 : index
    %3 = vector.load %arg3[%c0_3, %c0_4] : memref<1x256xf32, #tpu.memory_space<vmem>>, vector<1x256xf32>
    %4 = vector.broadcast %3 : vector<1x256xf32> to vector<8x256xf32>
    %5 = arith.addf %2, %4 : vector<8x256xf32>
    %cst_5 = arith.constant 0.000000e+00 : f32
    %6 = vector.broadcast %cst_5 : f32 to vector<8x256xf32>
    %7 = arith.maximumf %5, %6 : vector<8x256xf32>
    %8 = arith.truncf %7 : vector<8x256xf32> to vector<8x256xbf16>
    %c0_6 = arith.constant 0 : index
    %c0_7 = arith.constant 0 : index
    %9 = vector.load %arg4[%c0_6, %c0_7] : memref<256x128xbf16, #tpu.memory_space<vmem>>, vector<256x128xbf16>
    %cst_8 = arith.constant dense<0.000000e+00> : vector<8x128xf32>
    %10 = tpu.matmul %8, %9, %cst_8 {dimension_numbers = #tpu.dot_dimension_numbers<[1], [0], [0], [1], [0, 0, 1, 1], [], []>} : vector<8x256xbf16>, vector<256x128xbf16>, vector<8x128xf32> -> vector<8x128xf32>
    %c0_9 = arith.constant 0 : index
    %c0_10 = arith.constant 0 : index
    %11 = vector.load %arg5[%c0_9, %c0_10] : memref<1x128xf32, #tpu.memory_space<vmem>>, vector<1x128xf32>
    %12 = vector.broadcast %11 : vector<1x128xf32> to vector<8x128xf32>
    %13 = arith.addf %10, %12 : vector<8x128xf32>
    %c0_11 = arith.constant 0 : index
    %c0_12 = arith.constant 0 : index
    %14 = vector.load %arg6[%c0_11, %c0_12] : memref<8x128xf32, #tpu.memory_space<vmem>>, vector<8x128xf32>
    tpu.vector_store %arg6[%c0_11, %c0_12], %13 {strides = array<i32>} : memref<8x128xf32, #tpu.memory_space<vmem>>, vector<8x128xf32>,
    return
  }
  func.func @transform_0(%arg0: i32) -> (i32, i32) {
    %c0_i32 = arith.constant 0 : i32
    %c0_i32_0 = arith.constant 0 : i32
    %c0_i32_1 = arith.constant 0 : i32
    return %c0_i32, %c0_i32_0 : i32, i32
  }
  func.func @transform_1(%arg0: i32) -> (i32, i32) {
    %c0_i32 = arith.constant 0 : i32
    %c0_i32_0 = arith.constant 0 : i32
    %c0_i32_1 = arith.constant 0 : i32
    return %c0_i32, %c0_i32_0 : i32, i32
  }
  func.func @transform_2(%arg0: i32) -> (i32, i32) {
    %c0_i32 = arith.constant 0 : i32
    %c0_i32_0 = arith.constant 0 : i32
    %c0_i32_1 = arith.constant 0 : i32
    return %c0_i32, %c0_i32_0 : i32, i32
  }
  func.func @transform_3(%arg0: i32) -> (i32, i32) {
    %c0_i32 = arith.constant 0 : i32
    %c0_i32_0 = arith.constant 0 : i32
    %c0_i32_1 = arith.constant 0 : i32
    return %c0_i32, %c0_i32_0 : i32, i32
  }
  func.func @transform_4(%arg0: i32) -> (i32, i32) {
    %c0_i32 = arith.constant 0 : i32
    %c0_i32_0 = arith.constant 0 : i32
    %c0_i32_1 = arith.constant 0 : i32
    return %c0_i32, %c0_i32_0 : i32, i32
  }
  func.func @transform_5(%arg0: i32) -> (i32, i32) {
    %c0_i32 = arith.constant 0 : i32
    %c0_i32_0 = arith.constant 0 : i32
    %c0_i32_1 = arith.constant 0 : i32
    return %c0_i32, %c0_i32_0 : i32, i32
  }
}

</mosaic_0001>

<bundles_post_ra>
// kernel: cnn_policy_forward.4
= control target key start
LH: loop header
LB: loop body
LE: loop exit
PB: predicated region body
PF: predicated region fallthrough
CT: control target
= control target key end

     0   :  { %s1363_s12 = smov 0   ;;  %s1521_s0 = inlined_call_operand.vmem [shape: bf16[1,512,256], index: 0, kind: input, shape index: {}]   ;;  %s1522_s1 = inlined_call_operand.vmem [shape: bf16[256,128], index: 1, kind: input, shape index: {}]   ;;  %s1523_s2 = inlined_call_operand.vmem [shape: f32[1,128], index: 2, kind: input, shape index: {}]   ;;  %s1524_s3 = inlined_call_operand.vmem [shape: bf16[512,128], index: 3, kind: output, shape index: {}]  }
   0x1 LB: > { %s914_s13 = sadd.s32 4294967295, %s1341_s12   ;;  %p918_p0 = scmp.ge.s32.totalorder %s1341_s12, 1  ;;  %s1341_s12 = sphi %s1363_s12, %s13_s12  }
   0x2   : > { %p139_p1 = scmp.lt.s32.totalorder %s1341_s12, 3 }
   0x4   : > { %p140_p2 = pnand %p918_p0, %p139_p1 }
   0x5   : > { %v1271_v0 = vld [vmem:[%s1522_s1 + $0x40] sm:$0xff] (!%p140_p2)   ;;  %s919_s16 = sshll.u32 (!%p140_p2), %s914_s13, 5  ;;  %v1273_v2 = vld [vmem:[%s1522_s1 + $0x48] sm:$0xff] (!%p140_p2)   ;;  %v1275_v4 = vld [vmem:[%s1522_s1 + $0x50] sm:$0xff] (!%p140_p2)  }
   0x6   : > { %143 = sbr.rel (%p140_p2) target bundleno = 319 (0x13f), region = 32  ;;  %v1272_v1 = vld [vmem:[%s1522_s1] sm:$0xff] (!%p140_p2)   ;;  %1135 = vmatprep.subr.bf16.mxu0 (!%p140_p2), %v1271_v0  ;;  %1247 = vmatprep.subr.bf16.mxu1 (!%p140_p2), %v1271_v0  ;;  %v1274_v3 = vld [vmem:[%s1522_s1 + $0x8] sm:$0xff] (!%p140_p2)   ;;  %p165_p3 = scmp.lt.s32.totalorder (!%p140_p2), %s919_s16, 63  ;;  %v1276_v5 = vld [vmem:[%s1522_s1 + $0x10] sm:$0xff] (!%p140_p2)  }
   0x7   : > { %1136 = vmatpush3.bf16.msra.mxu0 (!%p140_p2), %v1272_v1  ;;  %1255 = vmatpush3.bf16.msra.mxu1 (!%p140_p2), %v1272_v1  ;;  %v1277_v6 = vld [vmem:[%s1522_s1 + $0x58] sm:$0xff] (!%p140_p2)   ;;  %v1279_v8 = vld [vmem:[%s1522_s1 + $0x60] sm:$0xff] (!%p140_p2)   ;;  %v1281_v10 = vld [vmem:[%s1522_s1 + $0x68] sm:$0xff] (!%p140_p2)  }
   0x8   : > { %1137 = vmatprep.subr.bf16.mxu0 (!%p140_p2), %v1273_v2  ;;  %1248 = vmatprep.subr.bf16.mxu1 (!%p140_p2), %v1273_v2  ;;  %v1278_v7 = vld [vmem:[%s1522_s1 + $0x18] sm:$0xff] (!%p140_p2)   ;;  %v1280_v9 = vld [vmem:[%s1522_s1 + $0x20] sm:$0xff] (!%p140_p2)   ;;  %v1282_v13 = vld [vmem:[%s1522_s1 + $0x28] sm:$0xff] (!%p140_p2)  }
   0x9   : > { %v1283_v14 = vld [vmem:[%s1522_s1 + $0x70] sm:$0xff] (!%p140_p2)   ;;  %v1285_v16 = vld [vmem:[%s1522_s1 + $0x78] sm:$0xff] (!%p140_p2)   ;;  %v1462_v50 = vld [vmem:[%s1523_s2] ss:$0 sm:$0xff] (!%p140_p2) }
   0xa   : > { %v1284_v15 = vld [vmem:[%s1522_s1 + $0x30] sm:$0xff] (!%p140_p2)   ;;  %v1286_v17 = vld [vmem:[%s1522_s1 + $0x38] sm:$0xff] (!%p140_p2)  }
   0xb   : > { %1138 = vmatpush3.bf16.msra.mxu0 (!%p140_p2), %v1274_v3  ;;  %1256 = vmatpush3.bf16.msra.mxu1 (!%p140_p2), %v1274_v3 }
   0xc   : > { %1139 = vmatprep.subr.bf16.mxu0 (!%p140_p2), %v1275_v4  ;;  %1249 = vmatprep.subr.bf16.mxu1 (!%p140_p2), %v1275_v4 }
   0xd   : > { %s1526_s16 = smov (!%p165_p3, %s919_s16), 63 }
   0xe   : > { %s1007_s4 = sshll.u32 %s1526_s16, 3  ;;  %s923_s28 = sshll.u32 %s1526_s16, 2 }
   0xf   : > { %1140 = vmatpush3.bf16.msra.mxu0 %v1276_v5  ;;  %1257 = vmatpush3.bf16.msra.mxu1 %v1276_v5  ;;  %s1404_s9 = scalar_lea.vmem %s1521_s0, %s1007_s4  ;;  %s1472_s4 = scalar_lea.vmem %s1524_s3, %s923_s28 }
  0x10   : > { %1141 = vmatprep.subr.bf16.mxu0 %v1277_v6  ;;  %1250 = vmatprep.subr.bf16.mxu1 %v1277_v6  ;;  %v1289_v11 = vld [vmem:[%s1404_s9 + $0x4] ss:$8 sps:$4 sm:$0xff]   ;;  %v1287_v18 = vld [vmem:[%s1404_s9] ss:$8 sps:$4 sm:$0xff]   ;;  %v1293_v20 = vld [vmem:[%s1404_s9 + $0x14] ss:$8 sps:$4 sm:$0xff]  }
  0x11   : > { %v1292_v12 = vld [vmem:[%s1404_s9 + $0x84] ss:$8 sps:$4 sm:$0xff]   ;;  %537 = vmatprep.mubr.bf16.mxu0 %v1289_v11  ;;  %v1290_v19 = vld [vmem:[%s1404_s9 + $0x80] ss:$8 sps:$4 sm:$0xff]   ;;  %v1295_v21 = vld [vmem:[%s1404_s9 + $0x94] ss:$8 sps:$4 sm:$0xff]  }
  0x12   : > { %601 = vmatprep.mubr.bf16.mxu1 %v1292_v12  ;;  %v1297_v22 = vld [vmem:[%s1404_s9 + $0x10] ss:$8 sps:$4 sm:$0xff]   ;;  %v1299_v24 = vld [vmem:[%s1404_s9 + $0x24] ss:$8 sps:$4 sm:$0xff]   ;;  %v1303_v26 = vld [vmem:[%s1404_s9 + $0x20] ss:$8 sps:$4 sm:$0xff]  }
  0x13   : > { %1142 = vmatpush3.bf16.msra.mxu0 %v1278_v7  ;;  %1258 = vmatpush3.bf16.msra.mxu1 %v1278_v7  ;;  %v1298_v23 = vld [vmem:[%s1404_s9 + $0x90] ss:$8 sps:$4 sm:$0xff]   ;;  %v1301_v25 = vld [vmem:[%s1404_s9 + $0xa4] ss:$8 sps:$4 sm:$0xff]   ;;  %v1304_v27 = vld [vmem:[%s1404_s9 + $0xa0] ss:$8 sps:$4 sm:$0xff]  }
  0x14   : > { %1143 = vmatprep.subr.bf16.mxu0 %v1279_v8  ;;  %1251 = vmatprep.subr.bf16.mxu1 %v1279_v8  ;;  %v1305_v28 = vld [vmem:[%s1404_s9 + $0x34] ss:$8 sps:$4 sm:$0xff]   ;;  %v1309_v30 = vld [vmem:[%s1404_s9 + $0x30] ss:$8 sps:$4 sm:$0xff]   ;;  %v1311_v32 = vld [vmem:[%s1404_s9 + $0x44] ss:$8 sps:$4 sm:$0xff]  }
  0x15   : > { %v1307_v29 = vld [vmem:[%s1404_s9 + $0xb4] ss:$8 sps:$4 sm:$0xff]   ;;  %v1310_v31 = vld [vmem:[%s1404_s9 + $0xb0] ss:$8 sps:$4 sm:$0xff]   ;;  %v1313_v33 = vld [vmem:[%s1404_s9 + $0xc4] ss:$8 sps:$4 sm:$0xff]  }
  0x16   : > { %v1315_v34 = vld [vmem:[%s1404_s9 + $0x40] ss:$8 sps:$4 sm:$0xff]   ;;  %v1317_v36 = vld [vmem:[%s1404_s9 + $0x54] ss:$8 sps:$4 sm:$0xff]   ;;  %v1321_v38 = vld [vmem:[%s1404_s9 + $0x50] ss:$8 sps:$4 sm:$0xff]  }
  0x17   : > { %1144 = vmatpush3.bf16.msra.mxu0 %v1280_v9  ;;  %1259 = vmatpush3.bf16.msra.mxu1 %v1280_v9  ;;  %v1316_v35 = vld [vmem:[%s1404_s9 + $0xc0] ss:$8 sps:$4 sm:$0xff]   ;;  %v1319_v37 = vld [vmem:[%s1404_s9 + $0xd4] ss:$8 sps:$4 sm:$0xff]   ;;  %v1322_v39 = vld [vmem:[%s1404_s9 + $0xd0] ss:$8 sps:$4 sm:$0xff]  }
  0x18   : > { %1145 = vmatprep.subr.bf16.mxu0 %v1281_v10  ;;  %1252 = vmatprep.subr.bf16.mxu1 %v1281_v10  ;;  %v1323_v40 = vld [vmem:[%s1404_s9 + $0x64] ss:$8 sps:$4 sm:$0xff]   ;;  %v1327_v42 = vld [vmem:[%s1404_s9 + $0x60] ss:$8 sps:$4 sm:$0xff]   ;;  %v1329_v44 = vld [vmem:[%s1404_s9 + $0x74] ss:$8 sps:$4 sm:$0xff]  }
  0x19   : > { %v1325_v41 = vld [vmem:[%s1404_s9 + $0xe4] ss:$8 sps:$4 sm:$0xff]   ;;  %v1328_v43 = vld [vmem:[%s1404_s9 + $0xe0] ss:$8 sps:$4 sm:$0xff]   ;;  %v1331_v45 = vld [vmem:[%s1404_s9 + $0xf4] ss:$8 sps:$4 sm:$0xff]  }
  0x1a   : > { %v1333_v46 = vld [vmem:[%s1404_s9 + $0x70] ss:$8 sps:$4 sm:$0xff]  }
  0x1b   : > { %1146 = vmatpush3.bf16.msra.mxu0 %v1282_v13  ;;  %1260 = vmatpush3.bf16.msra.mxu1 %v1282_v13  ;;  %v1334_v47 = vld [vmem:[%s1404_s9 + $0xf0] ss:$8 sps:$4 sm:$0xff]  }
  0x1c   : > { %1147 = vmatprep.subr.bf16.mxu0 %v1283_v14  ;;  %1253 = vmatprep.subr.bf16.mxu1 %v1283_v14 }
  0x1f   : > { %1148 = vmatpush3.bf16.msra.mxu0 %v1284_v15  ;;  %1261 = vmatpush3.bf16.msra.mxu1 %v1284_v15 }
  0x20   : > { %1149 = vmatprep.subr.bf16.mxu0 %v1285_v16  ;;  %1254 = vmatprep.subr.bf16.mxu1 %v1285_v16 }
  0x23   : > { %1150 = vmatpush3.bf16.msra.mxu0 %v1286_v17  ;;  %1262 = vmatpush3.bf16.msra.mxu1 %v1286_v17 }
  0x26   : > { %538 = vmatmul.mubr.bf16.vlgmr.msra.gmra.mrb[0].mxu0 %v1287_v18  ;;  %602 = vmatmul.mubr.bf16.vlgmr.msra.gmra.mrb[0].mxu1 %v1290_v19 }
  0x27   : > { %545 = vmatprep.mubr.bf16.mxu0 %v1293_v20  ;;  %609 = vmatprep.mubr.bf16.mxu1 %v1295_v21 }
  0x2e   : > { %546 = vmatmul.mubr.bf16.gmra.mrb[4].mxu0 %v1297_v22  ;;  %610 = vmatmul.mubr.bf16.gmra.mrb[4].mxu1 %v1298_v23 }
  0x2f   : > { %553 = vmatprep.mubr.bf16.mxu0 %v1299_v24  ;;  %617 = vmatprep.mubr.bf16.mxu1 %v1301_v25 }
  0x36   : > { %554 = vmatmul.mubr.bf16.gmra.mrb[8].mxu0 %v1303_v26  ;;  %618 = vmatmul.mubr.bf16.gmra.mrb[8].mxu1 %v1304_v27 }
  0x37   : > { %561 = vmatprep.mubr.bf16.mxu0 %v1305_v28  ;;  %625 = vmatprep.mubr.bf16.mxu1 %v1307_v29 }
  0x3e   : > { %562 = vmatmul.mubr.bf16.gmra.mrb[12].mxu0 %v1309_v30  ;;  %626 = vmatmul.mubr.bf16.gmra.mrb[12].mxu1 %v1310_v31 }
  0x3f   : > { %569 = vmatprep.mubr.bf16.mxu0 %v1311_v32  ;;  %633 = vmatprep.mubr.bf16.mxu1 %v1313_v33 }
  0x46   : > { %570 = vmatmul.mubr.bf16.gmra.mrb[16].mxu0 %v1315_v34  ;;  %634 = vmatmul.mubr.bf16.gmra.mrb[16].mxu1 %v1316_v35 }
  0x47   : > { %577 = vmatprep.mubr.bf16.mxu0 %v1317_v36  ;;  %641 = vmatprep.mubr.bf16.mxu1 %v1319_v37 }
  0x4e   : > { %578 = vmatmul.mubr.bf16.gmra.mrb[20].mxu0 %v1321_v38  ;;  %642 = vmatmul.mubr.bf16.gmra.mrb[20].mxu1 %v1322_v39 }
  0x4f   : > { %585 = vmatprep.mubr.bf16.mxu0 %v1323_v40  ;;  %649 = vmatprep.mubr.bf16.mxu1 %v1325_v41 }
  0x56   : > { %586 = vmatmul.mubr.bf16.gmra.mrb[24].mxu0 %v1327_v42  ;;  %650 = vmatmul.mubr.bf16.gmra.mrb[24].mxu1 %v1328_v43 }
  0x57   : > { %593 = vmatprep.mubr.bf16.mxu0 %v1329_v44  ;;  %657 = vmatprep.mubr.bf16.mxu1 %v1331_v45 }
  0x5e   : > { %594 = vmatmul.mubr.bf16.gmra.mrb[28].mxu0 %v1333_v46  ;;  %658 = vmatmul.mubr.bf16.gmra.mrb[28].mxu1 %v1334_v47 }
  0xf9   : > { %v1151_v48 = vpop.f32.mrb[0].mxu0  ;;  %v1199_v49 = vpop.f32.mrb[0].mxu1 }
  0xfa   : > { %v1152_v51 = vpop.f32.mrb[1].mxu0  ;;  %v1200_v52 = vpop.f32.mrb[1].mxu1 }
  0xfb   : > { %v1153_v53 = vadd.f32 %v1152_v51, %v1151_v48  ;;  %v1201_v54 = vadd.f32 %v1200_v52, %v1199_v49  ;;  %v1154_v55 = vpop.f32.mrb[2].mxu0  ;;  %v1202_v56 = vpop.f32.mrb[2].mxu1 }
  0xfc   : > { %v1155_v57 = vpop.f32.mrb[3].mxu0  ;;  %v1203_v58 = vpop.f32.mrb[3].mxu1 }
  0xfd   : > { %v540_v59 = vadd.f32 %v1153_v53, %v1462_v50  ;;  %v604_v60 = vadd.f32 %v1201_v54, %v1462_v50  ;;  %v1156_v61 = vadd.f32 %v1155_v57, %v1154_v55  ;;  %v1204_v62 = vadd.f32 %v1203_v58, %v1202_v56 }
  0xff   : > { %v543_v63 = vadd.f32 %v1156_v61, %v1462_v50  ;;  %v607_v0 = vadd.f32 %v1204_v62, %v1462_v50  ;;  %v666_v1 = vmax.f32 %v540_v59, 0.0  ;;  %v682_v2 = vmax.f32 %v604_v60, 0.0 }
 0x101   : > { %v667_v3 = vmax.f32 %v543_v63, 0.0  ;;  %v683_v4 = vmax.f32 %v607_v0, 0.0  ;;  %v1157_v5 = vpop.f32.mrb[4].mxu0  ;;  %v1205_v6 = vpop.f32.mrb[4].mxu1 }
 0x102   : > { %v1158_v7 = vpop.f32.mrb[5].mxu0  ;;  %v1206_v8 = vpop.f32.mrb[5].mxu1 }
 0x103   : > { %v1043_v9 = vpack.c.bf16 %v667_v3, %v666_v1  ;;  %v1083_v10 = vpack.c.bf16 %v683_v4, %v682_v2  ;;  %v1159_v11 = vadd.f32 %v1158_v7, %v1157_v5  ;;  %v1207_v12 = vadd.f32 %v1206_v8, %v1205_v6  ;;  %v1160_v13 = vpop.f32.mrb[6].mxu0  ;;  %v1208_v14 = vpop.f32.mrb[6].mxu1 }
 0x104   : > { %v1161_v15 = vpop.f32.mrb[7].mxu0  ;;  %v1209_v16 = vpop.f32.mrb[7].mxu1 }
 0x105   : > { %1044 = vst [vmem:[%s1472_s4] sm:$0xff] %v1043_v9   ;;  %1127 = vst [vmem:[%s1472_s4 + $0x40] sm:$0xff] %v1083_v10   ;;  %v548_v17 = vadd.f32 %v1159_v11, %v1462_v50  ;;  %v612_v18 = vadd.f32 %v1207_v12, %v1462_v50  ;;  %v1162_v19 = vadd.f32 %v1161_v15, %v1160_v13 }
 0x106   : > { %v1210_v20 = vadd.f32 %v1209_v16, %v1208_v14 }
 0x107   : > { %v551_v21 = vadd.f32 %v1162_v19, %v1462_v50  ;;  %v668_v23 = vmax.f32 %v548_v17, 0.0  ;;  %v684_v24 = vmax.f32 %v612_v18, 0.0 }
 0x108   : > { %v615_v22 = vadd.f32 %v1210_v20, %v1462_v50 }
 0x109   : > { %v669_v25 = vmax.f32 %v551_v21, 0.0  ;;  %v1163_v27 = vpop.f32.mrb[8].mxu0  ;;  %v1211_v28 = vpop.f32.mrb[8].mxu1 }
 0x10a   : > { %v685_v26 = vmax.f32 %v615_v22, 0.0  ;;  %v1164_v29 = vpop.f32.mrb[9].mxu0  ;;  %v1212_v30 = vpop.f32.mrb[9].mxu1 }
 0x10b   : > { %v1048_v31 = vpack.c.bf16 %v669_v25, %v668_v23  ;;  %v1165_v33 = vadd.f32 %v1164_v29, %v1163_v27  ;;  %v1213_v34 = vadd.f32 %v1212_v30, %v1211_v28  ;;  %v1166_v35 = vpop.f32.mrb[10].mxu0  ;;  %v1214_v36 = vpop.f32.mrb[10].mxu1 }
 0x10c   : > { %v1088_v32 = vpack.c.bf16 %v685_v26, %v684_v24  ;;  %v1167_v37 = vpop.f32.mrb[11].mxu0  ;;  %v1215_v38 = vpop.f32.mrb[11].mxu1 }
 0x10d   : > { %1120 = vst [vmem:[%s1472_s4 + $0x8] sm:$0xff] %v1048_v31   ;;  %v556_v39 = vadd.f32 %v1165_v33, %v1462_v50  ;;  %v620_v40 = vadd.f32 %v1213_v34, %v1462_v50  ;;  %v1168_v41 = vadd.f32 %v1167_v37, %v1166_v35  ;;  %v1216_v42 = vadd.f32 %v1215_v38, %v1214_v36 }
 0x10e   : > { %1128 = vst [vmem:[%s1472_s4 + $0x48] sm:$0xff] %v1088_v32  }
 0x10f   : > { %v559_v43 = vadd.f32 %v1168_v41, %v1462_v50  ;;  %v623_v44 = vadd.f32 %v1216_v42, %v1462_v50  ;;  %v670_v45 = vmax.f32 %v556_v39, 0.0  ;;  %v686_v46 = vmax.f32 %v620_v40, 0.0 }
 0x111   : > { %v671_v47 = vmax.f32 %v559_v43, 0.0  ;;  %v687_v48 = vmax.f32 %v623_v44, 0.0  ;;  %v1169_v49 = vpop.f32.mrb[12].mxu0  ;;  %v1217_v51 = vpop.f32.mrb[12].mxu1 }
 0x112   : > { %v1170_v52 = vpop.f32.mrb[13].mxu0  ;;  %v1218_v53 = vpop.f32.mrb[13].mxu1 }
 0x113   : > { %v1053_v54 = vpack.c.bf16 %v671_v47, %v670_v45  ;;  %v1093_v55 = vpack.c.bf16 %v687_v48, %v686_v46  ;;  %v1171_v56 = vadd.f32 %v1170_v52, %v1169_v49  ;;  %v1219_v57 = vadd.f32 %v1218_v53, %v1217_v51  ;;  %v1172_v58 = vpop.f32.mrb[14].mxu0  ;;  %v1220_v59 = vpop.f32.mrb[14].mxu1 }
 0x114   : > { %v1173_v60 = vpop.f32.mrb[15].mxu0  ;;  %v1221_v61 = vpop.f32.mrb[15].mxu1 }
 0x115   : > { %1121 = vst [vmem:[%s1472_s4 + $0x10] sm:$0xff] %v1053_v54   ;;  %1129 = vst [vmem:[%s1472_s4 + $0x50] sm:$0xff] %v1093_v55   ;;  %v564_v62 = vadd.f32 %v1171_v56, %v1462_v50  ;;  %v628_v63 = vadd.f32 %v1219_v57, %v1462_v50  ;;  %v1174_v0 = vadd.f32 %v1173_v60, %v1172_v58 }
 0x116   : > { %v1222_v1 = vadd.f32 %v1221_v61, %v1220_v59 }
 0x117   : > { %v567_v2 = vadd.f32 %v1174_v0, %v1462_v50  ;;  %v672_v4 = vmax.f32 %v564_v62, 0.0  ;;  %v688_v5 = vmax.f32 %v628_v63, 0.0 }
 0x118   : > { %v631_v3 = vadd.f32 %v1222_v1, %v1462_v50 }
 0x119   : > { %v673_v6 = vmax.f32 %v567_v2, 0.0  ;;  %v1175_v8 = vpop.f32.mrb[16].mxu0  ;;  %v1223_v9 = vpop.f32.mrb[16].mxu1 }
 0x11a   : > { %v689_v7 = vmax.f32 %v631_v3, 0.0  ;;  %v1176_v10 = vpop.f32.mrb[17].mxu0  ;;  %v1224_v11 = vpop.f32.mrb[17].mxu1 }
 0x11b   : > { %v1058_v12 = vpack.c.bf16 %v673_v6, %v672_v4  ;;  %v1177_v14 = vadd.f32 %v1176_v10, %v1175_v8  ;;  %v1225_v15 = vadd.f32 %v1224_v11, %v1223_v9  ;;  %v1178_v16 = vpop.f32.mrb[18].mxu0  ;;  %v1226_v17 = vpop.f32.mrb[18].mxu1 }
 0x11c   : > { %v1098_v13 = vpack.c.bf16 %v689_v7, %v688_v5  ;;  %v1179_v18 = vpop.f32.mrb[19].mxu0  ;;  %v1227_v19 = vpop.f32.mrb[19].mxu1 }
 0x11d   : > { %1122 = vst [vmem:[%s1472_s4 + $0x18] sm:$0xff] %v1058_v12   ;;  %v572_v20 = vadd.f32 %v1177_v14, %v1462_v50  ;;  %v636_v21 = vadd.f32 %v1225_v15, %v1462_v50  ;;  %v1180_v22 = vadd.f32 %v1179_v18, %v1178_v16  ;;  %v1228_v23 = vadd.f32 %v1227_v19, %v1226_v17 }
 0x11e   : > { %1130 = vst [vmem:[%s1472_s4 + $0x58] sm:$0xff] %v1098_v13  }
 0x11f   : > { %v575_v24 = vadd.f32 %v1180_v22, %v1462_v50  ;;  %v639_v25 = vadd.f32 %v1228_v23, %v1462_v50  ;;  %v674_v26 = vmax.f32 %v572_v20, 0.0  ;;  %v690_v27 = vmax.f32 %v636_v21, 0.0 }
 0x121   : > { %v675_v28 = vmax.f32 %v575_v24, 0.0  ;;  %v691_v29 = vmax.f32 %v639_v25, 0.0  ;;  %v1181_v30 = vpop.f32.mrb[20].mxu0  ;;  %v1229_v31 = vpop.f32.mrb[20].mxu1 }
 0x122   : > { %v1182_v32 = vpop.f32.mrb[21].mxu0  ;;  %v1230_v33 = vpop.f32.mrb[21].mxu1 }
 0x123   : > { %v1063_v34 = vpack.c.bf16 %v675_v28, %v674_v26  ;;  %v1103_v35 = vpack.c.bf16 %v691_v29, %v690_v27  ;;  %v1183_v36 = vadd.f32 %v1182_v32, %v1181_v30  ;;  %v1231_v37 = vadd.f32 %v1230_v33, %v1229_v31  ;;  %v1184_v38 = vpop.f32.mrb[22].mxu0  ;;  %v1232_v39 = vpop.f32.mrb[22].mxu1 }
 0x124   : > { %v1185_v40 = vpop.f32.mrb[23].mxu0  ;;  %v1233_v41 = vpop.f32.mrb[23].mxu1 }
 0x125   : > { %1123 = vst [vmem:[%s1472_s4 + $0x20] sm:$0xff] %v1063_v34   ;;  %1131 = vst [vmem:[%s1472_s4 + $0x60] sm:$0xff] %v1103_v35   ;;  %v580_v42 = vadd.f32 %v1183_v36, %v1462_v50  ;;  %v644_v43 = vadd.f32 %v1231_v37, %v1462_v50  ;;  %v1186_v44 = vadd.f32 %v1185_v40, %v1184_v38 }
 0x126   : > { %v1234_v45 = vadd.f32 %v1233_v41, %v1232_v39 }
 0x127   : > { %v583_v46 = vadd.f32 %v1186_v44, %v1462_v50  ;;  %v676_v48 = vmax.f32 %v580_v42, 0.0  ;;  %v692_v49 = vmax.f32 %v644_v43, 0.0 }
 0x128   : > { %v647_v47 = vadd.f32 %v1234_v45, %v1462_v50 }
 0x129   : > { %v677_v51 = vmax.f32 %v583_v46, 0.0  ;;  %v1187_v53 = vpop.f32.mrb[24].mxu0  ;;  %v1235_v54 = vpop.f32.mrb[24].mxu1 }
 0x12a   : > { %v693_v52 = vmax.f32 %v647_v47, 0.0  ;;  %v1188_v55 = vpop.f32.mrb[25].mxu0  ;;  %v1236_v56 = vpop.f32.mrb[25].mxu1 }
 0x12b   : > { %v1068_v57 = vpack.c.bf16 %v677_v51, %v676_v48  ;;  %v1189_v59 = vadd.f32 %v1188_v55, %v1187_v53  ;;  %v1237_v60 = vadd.f32 %v1236_v56, %v1235_v54  ;;  %v1190_v61 = vpop.f32.mrb[26].mxu0  ;;  %v1238_v62 = vpop.f32.mrb[26].mxu1 }
 0x12c   : > { %v1108_v58 = vpack.c.bf16 %v693_v52, %v692_v49  ;;  %v1191_v63 = vpop.f32.mrb[27].mxu0  ;;  %v1239_v0 = vpop.f32.mrb[27].mxu1 }
 0x12d   : > { %1124 = vst [vmem:[%s1472_s4 + $0x28] sm:$0xff] %v1068_v57   ;;  %v588_v1 = vadd.f32 %v1189_v59, %v1462_v50  ;;  %v652_v2 = vadd.f32 %v1237_v60, %v1462_v50  ;;  %v1192_v3 = vadd.f32 %v1191_v63, %v1190_v61  ;;  %v1240_v4 = vadd.f32 %v1239_v0, %v1238_v62 }
 0x12e   : > { %1132 = vst [vmem:[%s1472_s4 + $0x68] sm:$0xff] %v1108_v58  }
 0x12f   : > { %v591_v5 = vadd.f32 %v1192_v3, %v1462_v50  ;;  %v655_v6 = vadd.f32 %v1240_v4, %v1462_v50  ;;  %v678_v7 = vmax.f32 %v588_v1, 0.0  ;;  %v694_v8 = vmax.f32 %v652_v2, 0.0 }
 0x131   : > { %v679_v9 = vmax.f32 %v591_v5, 0.0  ;;  %v695_v10 = vmax.f32 %v655_v6, 0.0  ;;  %v1193_v11 = vpop.f32.mrb[28].mxu0  ;;  %v1241_v12 = vpop.f32.mrb[28].mxu1 }
 0x132   : > { %v1194_v13 = vpop.f32.mrb[29].mxu0  ;;  %v1242_v14 = vpop.f32.mrb[29].mxu1 }
 0x133   : > { %v1073_v15 = vpack.c.bf16 %v679_v9, %v678_v7  ;;  %v1113_v16 = vpack.c.bf16 %v695_v10, %v694_v8  ;;  %v1195_v17 = vadd.f32 %v1194_v13, %v1193_v11  ;;  %v1243_v18 = vadd.f32 %v1242_v14, %v1241_v12  ;;  %v1196_v19 = vpop.f32.mrb[30].mxu0  ;;  %v1244_v20 = vpop.f32.mrb[30].mxu1 }
 0x134   : > { %v1197_v21 = vpop.f32.mrb[31].mxu0  ;;  %v1245_v22 = vpop.f32.mrb[31].mxu1 }
 0x135   : > { %1125 = vst [vmem:[%s1472_s4 + $0x30] sm:$0xff] %v1073_v15   ;;  %1133 = vst [vmem:[%s1472_s4 + $0x70] sm:$0xff] %v1113_v16   ;;  %v596_v23 = vadd.f32 %v1195_v17, %v1462_v50  ;;  %v660_v24 = vadd.f32 %v1243_v18, %v1462_v50  ;;  %v1198_v25 = vadd.f32 %v1197_v21, %v1196_v19 }
 0x136   : > { %v1246_v26 = vadd.f32 %v1245_v22, %v1244_v20 }
 0x137   : > { %v599_v27 = vadd.f32 %v1198_v25, %v1462_v50  ;;  %v680_v29 = vmax.f32 %v596_v23, 0.0  ;;  %v696_v30 = vmax.f32 %v660_v24, 0.0 }
 0x138   : > { %v663_v28 = vadd.f32 %v1246_v26, %v1462_v50 }
 0x139   : > { %v681_v31 = vmax.f32 %v599_v27, 0.0 }
 0x13a   : > { %v697_v32 = vmax.f32 %v663_v28, 0.0 }
 0x13b   : > { %v1078_v33 = vpack.c.bf16 %v681_v31, %v680_v29 }
 0x13c   : > { %v1118_v34 = vpack.c.bf16 %v697_v32, %v696_v30 }
 0x13d   : > { %1126 = vst [vmem:[%s1472_s4 + $0x38] sm:$0xff] %v1078_v33  }
 0x13e   : > { %1134 = vst [vmem:[%s1472_s4 + $0x78] sm:$0xff] %v1118_v34  }
 0x13f PF: > { %s13_s12 = sadd.s32 1, %s1341_s12  }
 0x140   : > { %p10_p4 = scmp.ge.s32.totalorder %s13_s12, 4  }
 0x142   :  { %12 = sbr.rel (!%p10_p4) target bundleno = 1 (0x1), region = 62 }

// kernel: cnn_policy_forward.5
= control target key start
LH: loop header
LB: loop body
LE: loop exit
PB: predicated region body
PF: predicated region fallthrough
CT: control target
= control target key end

     0   :  { %s1486_s12 = smov 0   ;;  %s1488_s13 = smov 0   ;;  %s1848_s0 = inlined_call_operand.vmem [shape: bf16[4,128,256], index: 0, kind: input, shape index: {}]   ;;  %s1849_s1 = inlined_call_operand.vmem [shape: bf16[256,128], index: 1, kind: input, shape index: {}]   ;;  %s1850_s2 = inlined_call_operand.vmem [shape: f32[1,128], index: 2, kind: input, shape index: {}]   ;;  %s1851_s3 = inlined_call_operand.vmem [shape: bf16[128,128], index: 3, kind: output, shape index: {}]  }
   0x1   :  { %s1490_s14 = smov 0  }
   0x2 LB: > { %s1066_s15 = sadd.s32 4294967295, %s1464_s14   ;;  %s1503_s16 = sadd.s32 1, %s1464_s14   ;;  %s1464_s14 = sphi %s1490_s14, %s1854_s14   ;;  %s1460_s13 = sphi %s1488_s13, %s1853_s13   ;;  %s1456_s12 = sphi %s1486_s12, %s1852_s12  }
   0x3   : > { %s17_s17 = ssub.s32 %s1464_s14, %s1503_s16  ;;  %s20_s18 = sadd.s32 1, %s1460_s13 }
   0x4   : > { %p18_p0 = scmp.eq.s32.totalorder %s17_s17, 0  ;;  %p27_p1 = scmp.ne.s32.totalorder %s1460_s13, %s1456_s12 }
   0x5   : > { %p28_p2 = scmp.eq.s32.totalorder %s1464_s14, 0  ;;  %p1069_p4 = scmp.ge.s32.totalorder %s1464_s14, 2 }
   0x6   : > { %s1512_s19 = scalar_select %p18_p0, %s1460_s13, %s20_s18  }
   0x7   : > { %p29_p3 = por %p28_p2, %p27_p1  ;;  %127 = sbr.rel (%p1069_p4) target bundleno = 34 (0x22), region = 24 }
   0xe   : > { %130 = sbr.rel (!%p29_p3) target bundleno = 34 (0x22), region = 28  ;;  %s132_s20 = sand.u32 (%p29_p3), 1, %s1460_s13  }
   0xf   : > { %s1162_s21 = sshll.u32 (%p29_p3), %s1464_s14, 6  ;;  %s1070_s22 = sshll.u32 (%p29_p3), %s132_s20, 8 }
  0x10   : > { %s1520_s25 = scalar_lea.vmem (%p29_p3), %s1848_s0, %s1162_s21  ;;  %s1525_s26 = scalar_lea.vmem (%p29_p3), [#allocation2], %s1070_s22 }
  0x11   : > { %v228_v0 = vld [vmem:[%s1520_s25] sm:$0xff] (%p29_p3)  ;;  %v230_v1 = vld [vmem:[%s1520_s25 + $0x8] sm:$0xff] (%p29_p3)  ;;  %v232_v2 = vld [vmem:[%s1520_s25 + $0x10] sm:$0xff] (%p29_p3) }
  0x12   : > { %229 = vst [vmem:[%s1525_s26] sm:$0xff] (%p29_p3), %v228_v0  ;;  %231 = vst [vmem:[%s1525_s26 + $0x8] sm:$0xff] (%p29_p3), %v230_v1  ;;  %v234_v3 = vld [vmem:[%s1520_s25 + $0x18] sm:$0xff] (%p29_p3)  ;;  %v236_v4 = vld [vmem:[%s1520_s25 + $0x20] sm:$0xff] (%p29_p3) }
  0x13   : > { %233 = vst [vmem:[%s1525_s26 + $0x10] sm:$0xff] (%p29_p3), %v232_v2  ;;  %v238_v5 = vld [vmem:[%s1520_s25 + $0x28] sm:$0xff] (%p29_p3)  ;;  %235 = vst [vmem:[%s1525_s26 + $0x18] sm:$0xff] (%p29_p3), %v234_v3  ;;  %v240_v6 = vld [vmem:[%s1520_s25 + $0x30] sm:$0xff] (%p29_p3) }
  0x14   : > { %237 = vst [vmem:[%s1525_s26 + $0x20] sm:$0xff] (%p29_p3), %v236_v4  ;;  %239 = vst [vmem:[%s1525_s26 + $0x28] sm:$0xff] (%p29_p3), %v238_v5  ;;  %v242_v7 = vld [vmem:[%s1520_s25 + $0x38] sm:$0xff] (%p29_p3)  ;;  %v244_v8 = vld [vmem:[%s1520_s25 + $0x80] sm:$0xff] (%p29_p3) }
  0x15   : > { %241 = vst [vmem:[%s1525_s26 + $0x30] sm:$0xff] %v240_v6  ;;  %243 = vst [vmem:[%s1525_s26 + $0x38] sm:$0xff] %v242_v7  ;;  %v246_v9 = vld [vmem:[%s1520_s25 + $0x88] sm:$0xff]  ;;  %v248_v10 = vld [vmem:[%s1520_s25 + $0x90] sm:$0xff] }
  0x16   : > { %245 = vst [vmem:[%s1525_s26 + $0x40] sm:$0xff] %v244_v8  ;;  %v250_v11 = vld [vmem:[%s1520_s25 + $0x98] sm:$0xff]  ;;  %247 = vst [vmem:[%s1525_s26 + $0x48] sm:$0xff] %v246_v9  ;;  %v252_v12 = vld [vmem:[%s1520_s25 + $0xa0] sm:$0xff] }
  0x17   : > { %249 = vst [vmem:[%s1525_s26 + $0x50] sm:$0xff] %v248_v10  ;;  %251 = vst [vmem:[%s1525_s26 + $0x58] sm:$0xff] %v250_v11  ;;  %v254_v13 = vld [vmem:[%s1520_s25 + $0xa8] sm:$0xff]  ;;  %v256_v14 = vld [vmem:[%s1520_s25 + $0xb0] sm:$0xff] }
  0x18   : > { %253 = vst [vmem:[%s1525_s26 + $0x60] sm:$0xff] %v252_v12  ;;  %255 = vst [vmem:[%s1525_s26 + $0x68] sm:$0xff] %v254_v13  ;;  %v258_v15 = vld [vmem:[%s1520_s25 + $0xb8] sm:$0xff]  ;;  %v260_v16 = vld [vmem:[%s1520_s25 + $0x100] sm:$0xff] }
  0x19   : > { %257 = vst [vmem:[%s1525_s26 + $0x70] sm:$0xff] %v256_v14  ;;  %v262_v17 = vld [vmem:[%s1520_s25 + $0x108] sm:$0xff]  ;;  %259 = vst [vmem:[%s1525_s26 + $0x78] sm:$0xff] %v258_v15  ;;  %v264_v18 = vld [vmem:[%s1520_s25 + $0x110] sm:$0xff] }
  0x1a   : > { %261 = vst [vmem:[%s1525_s26 + $0x80] sm:$0xff] %v260_v16  ;;  %263 = vst [vmem:[%s1525_s26 + $0x88] sm:$0xff] %v262_v17  ;;  %v266_v19 = vld [vmem:[%s1520_s25 + $0x118] sm:$0xff]  ;;  %v268_v20 = vld [vmem:[%s1520_s25 + $0x120] sm:$0xff] }
  0x1b   : > { %265 = vst [vmem:[%s1525_s26 + $0x90] sm:$0xff] %v264_v18  ;;  %267 = vst [vmem:[%s1525_s26 + $0x98] sm:$0xff] %v266_v19  ;;  %v270_v21 = vld [vmem:[%s1520_s25 + $0x128] sm:$0xff]  ;;  %v272_v22 = vld [vmem:[%s1520_s25 + $0x130] sm:$0xff] }
  0x1c   : > { %269 = vst [vmem:[%s1525_s26 + $0xa0] sm:$0xff] %v268_v20  ;;  %v274_v23 = vld [vmem:[%s1520_s25 + $0x138] sm:$0xff]  ;;  %271 = vst [vmem:[%s1525_s26 + $0xa8] sm:$0xff] %v270_v21  ;;  %v276_v24 = vld [vmem:[%s1520_s25 + $0x180] sm:$0xff] }
  0x1d   : > { %273 = vst [vmem:[%s1525_s26 + $0xb0] sm:$0xff] %v272_v22  ;;  %275 = vst [vmem:[%s1525_s26 + $0xb8] sm:$0xff] %v274_v23  ;;  %v278_v25 = vld [vmem:[%s1520_s25 + $0x188] sm:$0xff]  ;;  %v280_v26 = vld [vmem:[%s1520_s25 + $0x190] sm:$0xff] }
  0x1e   : > { %277 = vst [vmem:[%s1525_s26 + $0xc0] sm:$0xff] %v276_v24  ;;  %279 = vst [vmem:[%s1525_s26 + $0xc8] sm:$0xff] %v278_v25  ;;  %v282_v27 = vld [vmem:[%s1520_s25 + $0x198] sm:$0xff]  ;;  %v284_v28 = vld [vmem:[%s1520_s25 + $0x1a0] sm:$0xff] }
  0x1f   : > { %281 = vst [vmem:[%s1525_s26 + $0xd0] sm:$0xff] %v280_v26  ;;  %v286_v29 = vld [vmem:[%s1520_s25 + $0x1a8] sm:$0xff]  ;;  %283 = vst [vmem:[%s1525_s26 + $0xd8] sm:$0xff] %v282_v27  ;;  %v288_v30 = vld [vmem:[%s1520_s25 + $0x1b0] sm:$0xff] }
  0x20   : > { %285 = vst [vmem:[%s1525_s26 + $0xe0] sm:$0xff] %v284_v28  ;;  %287 = vst [vmem:[%s1525_s26 + $0xe8] sm:$0xff] %v286_v29  ;;  %v290_v31 = vld [vmem:[%s1520_s25 + $0x1b8] sm:$0xff] }
  0x21   : > { %289 = vst [vmem:[%s1525_s26 + $0xf0] sm:$0xff] %v288_v30  ;;  %291 = vst [vmem:[%s1525_s26 + $0xf8] sm:$0xff] %v290_v31 }
  0x22 PF: > { %p1074_p5 = scmp.ge.s32.totalorder %s1464_s14, 1  ;;  %p296_p6 = scmp.lt.s32.totalorder %s1464_s14, 3 }
  0x24   : > { %p297_p7 = pnand %p1074_p5, %p296_p6 }
  0x25   : > { %v1378_v32 = vld [vmem:[%s1849_s1 + $0x40] sm:$0xff] (!%p297_p7)   ;;  %v1380_v34 = vld [vmem:[%s1849_s1 + $0x48] sm:$0xff] (!%p297_p7)   ;;  %v1607_v36 = vld [vmem:[%s1849_s1 + $0x50] sm:$0xff] (!%p297_p7)   ;;  %s303_s20 = sand.u32 (!%p297_p7), 1, %s1456_s12   ;;  %s1076_s18 = sshll.u32 (!%p297_p7), %s1066_s15, 3 }
  0x26   : > { %300 = sbr.rel (%p297_p7) target bundleno = 354 (0x162), region = 66  ;;  %v1379_v33 = vld [vmem:[%s1849_s1] sm:$0xff] (!%p297_p7)   ;;  %1194 = vmatprep.subr.bf16.mxu0 (!%p297_p7), %v1378_v32  ;;  %1234 = vmatprep.subr.bf16.mxu1 (!%p297_p7), %v1378_v32  ;;  %v1602_v35 = vld [vmem:[%s1849_s1 + $0x8] sm:$0xff] (!%p297_p7)   ;;  %v1614_v37 = vld [vmem:[%s1849_s1 + $0x10] sm:$0xff] (!%p297_p7)   ;;  %s1075_s23 = sshll.u32 (!%p297_p7), %s303_s20, 8 }
  0x27   : > { %1195 = vmatpush3.bf16.msra.mxu0 (!%p297_p7), %v1379_v33  ;;  %1235 = vmatpush3.bf16.msra.mxu1 (!%p297_p7), %v1379_v33  ;;  %v1621_v38 = vld [vmem:[%s1849_s1 + $0x58] sm:$0xff] (!%p297_p7)   ;;  %v1636_v40 = vld [vmem:[%s1849_s1 + $0x60] sm:$0xff] (!%p297_p7)   ;;  %v1650_v42 = vld [vmem:[%s1849_s1 + $0x68] sm:$0xff] (!%p297_p7)   ;;  %s1652_s29 = scalar_lea.vmem (!%p297_p7), [#allocation2], %s1075_s23  ;;  %p328_p8 = scmp.lt.s32.totalorder (!%p297_p7), %s1076_s18, 15 }
  0x28   : > { %1196 = vmatprep.subr.bf16.mxu0 (!%p297_p7), %v1380_v34  ;;  %1236 = vmatprep.subr.bf16.mxu1 (!%p297_p7), %v1380_v34  ;;  %v1629_v39 = vld [vmem:[%s1849_s1 + $0x18] sm:$0xff] (!%p297_p7)   ;;  %v1643_v41 = vld [vmem:[%s1849_s1 + $0x20] sm:$0xff] (!%p297_p7)   ;;  %v1661_v45 = vld [vmem:[%s1849_s1 + $0x28] sm:$0xff] (!%p297_p7)  }
  0x29   : > { %v1396_v43 = vld [vmem:[%s1652_s29 + $0x4] ss:$8 sps:$4 sm:$0xff] (!%p297_p7)   ;;  %v1668_v46 = vld [vmem:[%s1849_s1 + $0x70] sm:$0xff] (!%p297_p7)   ;;  %v1682_v48 = vld [vmem:[%s1849_s1 + $0x78] sm:$0xff] (!%p297_p7)  }
  0x2a   : > { %v1399_v44 = vld [vmem:[%s1652_s29 + $0x44] ss:$8 sps:$4 sm:$0xff] (!%p297_p7)   ;;  %542 = vmatprep.mubr.bf16.mxu0 (!%p297_p7), %v1396_v43  ;;  %v1675_v47 = vld [vmem:[%s1849_s1 + $0x30] sm:$0xff] (!%p297_p7)   ;;  %v1689_v49 = vld [vmem:[%s1849_s1 + $0x38] sm:$0xff] (!%p297_p7)  }
  0x2b   : > { %1197 = vmatpush3.bf16.msra.mxu0 (!%p297_p7), %v1602_v35  ;;  %1237 = vmatpush3.bf16.msra.mxu1 (!%p297_p7), %v1602_v35  ;;  %v1394_v50 = vld [vmem:[%s1652_s29] ss:$8 sps:$4 sm:$0xff] (!%p297_p7)   ;;  %v1400_v52 = vld [vmem:[%s1652_s29 + $0x14] ss:$8 sps:$4 sm:$0xff] (!%p297_p7)   ;;  %v1404_v54 = vld [vmem:[%s1652_s29 + $0x10] ss:$8 sps:$4 sm:$0xff] (!%p297_p7)  }
  0x2c   : > { %1198 = vmatprep.subr.bf16.mxu0 (!%p297_p7), %v1607_v36  ;;  %1238 = vmatprep.subr.bf16.mxu1 (!%p297_p7), %v1607_v36  ;;  %v1397_v51 = vld [vmem:[%s1652_s29 + $0x40] ss:$8 sps:$4 sm:$0xff] (!%p297_p7)   ;;  %v1402_v53 = vld [vmem:[%s1652_s29 + $0x54] ss:$8 sps:$4 sm:$0xff] (!%p297_p7)   ;;  %v1405_v55 = vld [vmem:[%s1652_s29 + $0x50] ss:$8 sps:$4 sm:$0xff] (!%p297_p7)  }
  0x2d   : > { %656 = vmatprep.mubr.bf16.mxu1 %v1399_v44  ;;  %v1406_v56 = vld [vmem:[%s1652_s29 + $0x24] ss:$8 sps:$4 sm:$0xff]   ;;  %v1410_v58 = vld [vmem:[%s1652_s29 + $0x20] ss:$8 sps:$4 sm:$0xff]   ;;  %v1412_v60 = vld [vmem:[%s1652_s29 + $0x34] ss:$8 sps:$4 sm:$0xff]  }
  0x2e   : > { %v1408_v57 = vld [vmem:[%s1652_s29 + $0x64] ss:$8 sps:$4 sm:$0xff]   ;;  %v1411_v59 = vld [vmem:[%s1652_s29 + $0x60] ss:$8 sps:$4 sm:$0xff]   ;;  %v1414_v61 = vld [vmem:[%s1652_s29 + $0x74] ss:$8 sps:$4 sm:$0xff]  }
  0x2f   : > { %1199 = vmatpush3.bf16.msra.mxu0 %v1614_v37  ;;  %1239 = vmatpush3.bf16.msra.mxu1 %v1614_v37  ;;  %v1416_v62 = vld [vmem:[%s1652_s29 + $0x30] ss:$8 sps:$4 sm:$0xff]   ;;  %v1420_v0 = vld [vmem:[%s1652_s29 + $0x84] ss:$8 sps:$4 sm:$0xff]   ;;  %v1418_v2 = vld [vmem:[%s1652_s29 + $0x80] ss:$8 sps:$4 sm:$0xff]  }
  0x30   : > { %1200 = vmatprep.subr.bf16.mxu0 %v1621_v38  ;;  %1240 = vmatprep.subr.bf16.mxu1 %v1621_v38  ;;  %v1417_v63 = vld [vmem:[%s1652_s29 + $0x70] ss:$8 sps:$4 sm:$0xff]   ;;  %v1423_v1 = vld [vmem:[%s1652_s29 + $0xc4] ss:$8 sps:$4 sm:$0xff]   ;;  %v1421_v3 = vld [vmem:[%s1652_s29 + $0xc0] ss:$8 sps:$4 sm:$0xff]  }
  0x31   : > { %v1424_v4 = vld [vmem:[%s1652_s29 + $0x94] ss:$8 sps:$4 sm:$0xff]   ;;  %v1428_v6 = vld [vmem:[%s1652_s29 + $0x90] ss:$8 sps:$4 sm:$0xff]   ;;  %v1430_v8 = vld [vmem:[%s1652_s29 + $0xa4] ss:$8 sps:$4 sm:$0xff]  }
  0x32   : > { %v1426_v5 = vld [vmem:[%s1652_s29 + $0xd4] ss:$8 sps:$4 sm:$0xff]   ;;  %v1429_v7 = vld [vmem:[%s1652_s29 + $0xd0] ss:$8 sps:$4 sm:$0xff]   ;;  %v1432_v9 = vld [vmem:[%s1652_s29 + $0xe4] ss:$8 sps:$4 sm:$0xff]  }
  0x33   : > { %1201 = vmatpush3.bf16.msra.mxu0 %v1629_v39  ;;  %1241 = vmatpush3.bf16.msra.mxu1 %v1629_v39  ;;  %v1434_v10 = vld [vmem:[%s1652_s29 + $0xa0] ss:$8 sps:$4 sm:$0xff]   ;;  %v1436_v12 = vld [vmem:[%s1652_s29 + $0xb4] ss:$8 sps:$4 sm:$0xff]   ;;  %v1440_v14 = vld [vmem:[%s1652_s29 + $0xb0] ss:$8 sps:$4 sm:$0xff]  }
  0x34   : > { %1202 = vmatprep.subr.bf16.mxu0 %v1636_v40  ;;  %1242 = vmatprep.subr.bf16.mxu1 %v1636_v40  ;;  %v1435_v11 = vld [vmem:[%s1652_s29 + $0xe0] ss:$8 sps:$4 sm:$0xff]   ;;  %v1438_v13 = vld [vmem:[%s1652_s29 + $0xf4] ss:$8 sps:$4 sm:$0xff]   ;;  %v1441_v15 = vld [vmem:[%s1652_s29 + $0xf0] ss:$8 sps:$4 sm:$0xff]  }
  0x35   : > { %s1856_s18 = smov (!%p328_p8, %s1076_s18), 15 }
  0x36   : > { %s1077_s14 = sshll.u32 %s1856_s18, 2 }
  0x37   : > { %1203 = vmatpush3.bf16.msra.mxu0 %v1643_v41  ;;  %1243 = vmatpush3.bf16.msra.mxu1 %v1643_v41  ;;  %s1811_s23 = scalar_lea.vmem %s1851_s3, %s1077_s14 }
  0x38   : > { %1204 = vmatprep.subr.bf16.mxu0 %v1650_v42  ;;  %1244 = vmatprep.subr.bf16.mxu1 %v1650_v42 }
  0x3b   : > { %1205 = vmatpush3.bf16.msra.mxu0 %v1661_v45  ;;  %1245 = vmatpush3.bf16.msra.mxu1 %v1661_v45 }
  0x3c   : > { %1206 = vmatprep.subr.bf16.mxu0 %v1668_v46  ;;  %1246 = vmatprep.subr.bf16.mxu1 %v1668_v46 }
  0x3f   : > { %1207 = vmatpush3.bf16.msra.mxu0 %v1675_v47  ;;  %1247 = vmatpush3.bf16.msra.mxu1 %v1675_v47 }
  0x40   : > { %1208 = vmatprep.subr.bf16.mxu0 %v1682_v48  ;;  %1248 = vmatprep.subr.bf16.mxu1 %v1682_v48 }
  0x43   : > { %1209 = vmatpush3.bf16.msra.mxu0 %v1689_v49  ;;  %1249 = vmatpush3.bf16.msra.mxu1 %v1689_v49 }
  0x44   : > { %1274 = vmatprep.subr.bf16.mxu0 %v1378_v32  ;;  %1314 = vmatprep.subr.bf16.mxu1 %v1378_v32 }
  0x46   : > { %543 = vmatmul.mubr.bf16.vlgmr.msra.gmra.mrb[0].mxu0 %v1394_v50  ;;  %657 = vmatmul.mubr.bf16.vlgmr.msra.gmra.mrb[0].mxu1 %v1397_v51 }
  0x47   : > { %1275 = vmatpush3.bf16.msra.mxu0 %v1379_v33  ;;  %1315 = vmatpush3.bf16.msra.mxu1 %v1379_v33 }
  0x48   : > { %1276 = vmatprep.subr.bf16.mxu0 %v1380_v34  ;;  %1316 = vmatprep.subr.bf16.mxu1 %v1380_v34 }
  0x49   : > { %550 = vmatprep.mubr.bf16.mxu0 %v1400_v52  ;;  %664 = vmatprep.mubr.bf16.mxu1 %v1402_v53 }
  0x4b   : > { %1277 = vmatpush3.bf16.msra.mxu0 %v1602_v35  ;;  %1317 = vmatpush3.bf16.msra.mxu1 %v1602_v35 }
  0x4c   : > { %1278 = vmatprep.subr.bf16.mxu0 %v1607_v36  ;;  %1318 = vmatprep.subr.bf16.mxu1 %v1607_v36 }
  0x4e   : > { %551 = vmatmul.mubr.bf16.gmra.mrb[4].mxu0 %v1404_v54  ;;  %665 = vmatmul.mubr.bf16.gmra.mrb[4].mxu1 %v1405_v55 }
  0x4f   : > { %1279 = vmatpush3.bf16.msra.mxu0 %v1614_v37  ;;  %1319 = vmatpush3.bf16.msra.mxu1 %v1614_v37 }
  0x50   : > { %1280 = vmatprep.subr.bf16.mxu0 %v1621_v38  ;;  %1320 = vmatprep.subr.bf16.mxu1 %v1621_v38 }
  0x51   : > { %558 = vmatprep.mubr.bf16.mxu0 %v1406_v56  ;;  %672 = vmatprep.mubr.bf16.mxu1 %v1408_v57 }
  0x53   : > { %1281 = vmatpush3.bf16.msra.mxu0 %v1629_v39  ;;  %1321 = vmatpush3.bf16.msra.mxu1 %v1629_v39 }
  0x54   : > { %1282 = vmatprep.subr.bf16.mxu0 %v1636_v40  ;;  %1322 = vmatprep.subr.bf16.mxu1 %v1636_v40 }
  0x56   : > { %559 = vmatmul.mubr.bf16.gmra.mrb[8].mxu0 %v1410_v58  ;;  %673 = vmatmul.mubr.bf16.gmra.mrb[8].mxu1 %v1411_v59 }
  0x57   : > { %1283 = vmatpush3.bf16.msra.mxu0 %v1643_v41  ;;  %1323 = vmatpush3.bf16.msra.mxu1 %v1643_v41 }
  0x58   : > { %1284 = vmatprep.subr.bf16.mxu0 %v1650_v42  ;;  %1324 = vmatprep.subr.bf16.mxu1 %v1650_v42 }
  0x59   : > { %566 = vmatprep.mubr.bf16.mxu0 %v1412_v60  ;;  %680 = vmatprep.mubr.bf16.mxu1 %v1414_v61 }
  0x5b   : > { %1285 = vmatpush3.bf16.msra.mxu0 %v1661_v45  ;;  %1325 = vmatpush3.bf16.msra.mxu1 %v1661_v45 }
  0x5c   : > { %1286 = vmatprep.subr.bf16.mxu0 %v1668_v46  ;;  %1326 = vmatprep.subr.bf16.mxu1 %v1668_v46 }
  0x5e   : > { %567 = vmatmul.mubr.bf16.gmra.mrb[12].mxu0 %v1416_v62  ;;  %681 = vmatmul.mubr.bf16.gmra.mrb[12].mxu1 %v1417_v63 }
  0x5f   : > { %1287 = vmatpush3.bf16.msra.mxu0 %v1675_v47  ;;  %1327 = vmatpush3.bf16.msra.mxu1 %v1675_v47 }
  0x60   : > { %1288 = vmatprep.subr.bf16.mxu0 %v1682_v48  ;;  %1328 = vmatprep.subr.bf16.mxu1 %v1682_v48 }
  0x61   : > { %778 = vmatprep.mubr.bf16.mxu0 %v1420_v0  ;;  %900 = vmatprep.mubr.bf16.mxu1 %v1423_v1 }
  0x63   : > { %1289 = vmatpush3.bf16.msra.mxu0 %v1689_v49  ;;  %1329 = vmatpush3.bf16.msra.mxu1 %v1689_v49 }
  0x66   : > { %779 = vmatmul.mubr.bf16.vlgmr.msra.gmra.mrb[16].mxu0 %v1418_v2  ;;  %901 = vmatmul.mubr.bf16.vlgmr.msra.gmra.mrb[16].mxu1 %v1421_v3 }
  0x67   : > { %786 = vmatprep.mubr.bf16.mxu0 %v1424_v4  ;;  %908 = vmatprep.mubr.bf16.mxu1 %v1426_v5 }
  0x6e   : > { %787 = vmatmul.mubr.bf16.gmra.mrb[20].mxu0 %v1428_v6  ;;  %909 = vmatmul.mubr.bf16.gmra.mrb[20].mxu1 %v1429_v7 }
  0x6f   : > { %794 = vmatprep.mubr.bf16.mxu0 %v1430_v8  ;;  %916 = vmatprep.mubr.bf16.mxu1 %v1432_v9 }
  0x76   : > { %795 = vmatmul.mubr.bf16.gmra.mrb[24].mxu0 %v1434_v10  ;;  %917 = vmatmul.mubr.bf16.gmra.mrb[24].mxu1 %v1435_v11 }
  0x77   : > { %802 = vmatprep.mubr.bf16.mxu0 %v1436_v12  ;;  %924 = vmatprep.mubr.bf16.mxu1 %v1438_v13 }
  0x7e   : > { %803 = vmatmul.mubr.bf16.gmra.mrb[28].mxu0 %v1440_v14  ;;  %925 = vmatmul.mubr.bf16.gmra.mrb[28].mxu1 %v1441_v15 }
 0x119   : > { %v1210_v16 = vpop.f32.mrb[0].mxu0  ;;  %v1250_v17 = vpop.f32.mrb[0].mxu1 }
 0x11a   : > { %v1211_v18 = vpop.f32.mrb[1].mxu0  ;;  %v1251_v19 = vpop.f32.mrb[1].mxu1 }
 0x11b   : > { %v1751_v20 = vadd.f32 %v1211_v18, %v1210_v16  ;;  %v1753_v21 = vadd.f32 %v1251_v19, %v1250_v17  ;;  %v1213_v22 = vpop.f32.mrb[2].mxu0  ;;  %v1253_v23 = vpop.f32.mrb[2].mxu1 }
 0x11c   : > { %v1214_v24 = vpop.f32.mrb[3].mxu0  ;;  %v1254_v25 = vpop.f32.mrb[3].mxu1 }
 0x11d   : > { %v689_v26 = vmax.f32 %v1751_v20, %v1753_v21  ;;  %v1757_v27 = vadd.f32 %v1214_v24, %v1213_v22  ;;  %v1255_v28 = vadd.f32 %v1254_v25, %v1253_v23  ;;  %v1801_v21 = vld [vmem:[%s1850_s2] ss:$0 sm:$0xff] }
 0x11f   : > { %v690_v29 = vmax.f32 %v1757_v27, %v1255_v28 }
 0x121   : > { %v1216_v30 = vpop.f32.mrb[4].mxu0  ;;  %v1256_v31 = vpop.f32.mrb[4].mxu1 }
 0x122   : > { %v1217_v32 = vpop.f32.mrb[5].mxu0  ;;  %v1257_v33 = vpop.f32.mrb[5].mxu1 }
 0x123   : > { %v1760_v34 = vadd.f32 %v1217_v32, %v1216_v30  ;;  %v1762_v35 = vadd.f32 %v1257_v33, %v1256_v31  ;;  %v1219_v36 = vpop.f32.mrb[6].mxu0  ;;  %v1259_v37 = vpop.f32.mrb[6].mxu1 }
 0x124   : > { %v1220_v38 = vpop.f32.mrb[7].mxu0  ;;  %v1260_v39 = vpop.f32.mrb[7].mxu1 }
 0x125   : > { %v691_v40 = vmax.f32 %v1760_v34, %v1762_v35  ;;  %v1766_v41 = vadd.f32 %v1220_v38, %v1219_v36  ;;  %v1768_v42 = vadd.f32 %v1260_v39, %v1259_v37 }
 0x127   : > { %v692_v43 = vmax.f32 %v1766_v41, %v1768_v42 }
 0x129   : > { %v1222_v44 = vpop.f32.mrb[8].mxu0  ;;  %v1262_v45 = vpop.f32.mrb[8].mxu1 }
 0x12a   : > { %v1223_v46 = vpop.f32.mrb[9].mxu0  ;;  %v1263_v47 = vpop.f32.mrb[9].mxu1 }
 0x12b   : > { %v1772_v48 = vadd.f32 %v1223_v46, %v1222_v44  ;;  %v1774_v49 = vadd.f32 %v1263_v47, %v1262_v45  ;;  %v1225_v50 = vpop.f32.mrb[10].mxu0  ;;  %v1265_v51 = vpop.f32.mrb[10].mxu1 }
 0x12c   : > { %v1226_v52 = vpop.f32.mrb[11].mxu0  ;;  %v1266_v53 = vpop.f32.mrb[11].mxu1 }
 0x12d   : > { %v693_v54 = vmax.f32 %v1772_v48, %v1774_v49  ;;  %v1778_v55 = vadd.f32 %v1226_v52, %v1225_v50  ;;  %v1780_v56 = vadd.f32 %v1266_v53, %v1265_v51 }
 0x12f   : > { %v694_v57 = vmax.f32 %v1778_v55, %v1780_v56 }
 0x131   : > { %v1228_v58 = vpop.f32.mrb[12].mxu0  ;;  %v1268_v59 = vpop.f32.mrb[12].mxu1 }
 0x132   : > { %v1229_v60 = vpop.f32.mrb[13].mxu0  ;;  %v1269_v61 = vpop.f32.mrb[13].mxu1 }
 0x133   : > { %v1784_v62 = vadd.f32 %v1229_v60, %v1228_v58  ;;  %v1786_v63 = vadd.f32 %v1269_v61, %v1268_v59  ;;  %v1231_v0 = vpop.f32.mrb[14].mxu0  ;;  %v1271_v1 = vpop.f32.mrb[14].mxu1 }
 0x134   : > { %v1232_v2 = vpop.f32.mrb[15].mxu0  ;;  %v1272_v3 = vpop.f32.mrb[15].mxu1 }
 0x135   : > { %v695_v4 = vmax.f32 %v1784_v62, %v1786_v63  ;;  %v1790_v5 = vadd.f32 %v1232_v2, %v1231_v0  ;;  %v1792_v6 = vadd.f32 %v1272_v3, %v1271_v1 }
 0x137   : > { %v696_v7 = vmax.f32 %v1790_v5, %v1792_v6 }
 0x139   : > { %v1290_v8 = vpop.f32.mrb[16].mxu0  ;;  %v1330_v9 = vpop.f32.mrb[16].mxu1 }
 0x13a   : > { %v1291_v10 = vpop.f32.mrb[17].mxu0  ;;  %v1331_v11 = vpop.f32.mrb[17].mxu1 }
 0x13b   : > { %v1292_v12 = vadd.f32 %v1291_v10, %v1290_v8  ;;  %v1332_v13 = vadd.f32 %v1331_v11, %v1330_v9  ;;  %v1293_v14 = vpop.f32.mrb[18].mxu0  ;;  %v1333_v15 = vpop.f32.mrb[18].mxu1 }
 0x13c   : > { %v1294_v16 = vpop.f32.mrb[19].mxu0  ;;  %v1334_v17 = vpop.f32.mrb[19].mxu1 }
 0x13d   : > { %v811_v18 = vmax.f32 %v689_v26, %v1292_v12  ;;  %v1295_v19 = vadd.f32 %v1294_v16, %v1293_v14  ;;  %v1335_v20 = vadd.f32 %v1334_v17, %v1333_v15 }
 0x13f   : > { %v933_v22 = vmax.f32 %v811_v18, %v1332_v13  ;;  %v812_v23 = vmax.f32 %v690_v29, %v1295_v19 }
 0x141   : > { %v948_v24 = vadd.f32 %v1801_v21, %v933_v22  ;;  %v934_v25 = vmax.f32 %v812_v23, %v1335_v20  ;;  %v1296_v27 = vpop.f32.mrb[20].mxu0  ;;  %v1336_v28 = vpop.f32.mrb[20].mxu1 }
 0x142   : > { %v1297_v30 = vpop.f32.mrb[21].mxu0  ;;  %v1337_v31 = vpop.f32.mrb[21].mxu1 }
 0x143   : > { %v949_v26 = vadd.f32 %v1801_v21, %v934_v25  ;;  %v1298_v32 = vadd.f32 %v1297_v30, %v1296_v27  ;;  %v1338_v33 = vadd.f32 %v1337_v31, %v1336_v28  ;;  %v1299_v36 = vpop.f32.mrb[22].mxu0  ;;  %v1339_v37 = vpop.f32.mrb[22].mxu1  ;;  %v956_v38 = vmax.f32 %v948_v24, 0.0 }
 0x144   : > { %v1300_v39 = vpop.f32.mrb[23].mxu0  ;;  %v1340_v44 = vpop.f32.mrb[23].mxu1 }
 0x145   : > { %v957_v45 = vmax.f32 %v949_v26, 0.0  ;;  %v813_v29 = vmax.f32 %v691_v40, %v1298_v32  ;;  %v1301_v46 = vadd.f32 %v1300_v39, %v1299_v36  ;;  %v1341_v47 = vadd.f32 %v1340_v44, %v1339_v37 }
 0x147   : > { %v1174_v50 = vpack.c.bf16 %v957_v45, %v956_v38  ;;  %v935_v51 = vmax.f32 %v813_v29, %v1338_v33  ;;  %v814_v52 = vmax.f32 %v692_v43, %v1301_v46 }
 0x149   : > { %1175 = vst [vmem:[%s1811_s23] sm:$0xff] %v1174_v50   ;;  %v950_v53 = vadd.f32 %v1801_v21, %v935_v51  ;;  %v936_v58 = vmax.f32 %v814_v52, %v1341_v47  ;;  %v1302_v34 = vpop.f32.mrb[24].mxu0  ;;  %v1342_v35 = vpop.f32.mrb[24].mxu1 }
 0x14a   : > { %v1303_v40 = vpop.f32.mrb[25].mxu0  ;;  %v1343_v59 = vpop.f32.mrb[25].mxu1 }
 0x14b   : > { %v951_v60 = vadd.f32 %v1801_v21, %v936_v58  ;;  %v1304_v61 = vadd.f32 %v1303_v40, %v1302_v34  ;;  %v1344_v0 = vadd.f32 %v1343_v59, %v1342_v35  ;;  %v1305_v1 = vpop.f32.mrb[26].mxu0  ;;  %v1345_v2 = vpop.f32.mrb[26].mxu1  ;;  %v958_v3 = vmax.f32 %v950_v53, 0.0 }
 0x14c   : > { %v1306_v8 = vpop.f32.mrb[27].mxu0  ;;  %v1346_v9 = vpop.f32.mrb[27].mxu1 }
 0x14d   : > { %v959_v41 = vmax.f32 %v951_v60, 0.0  ;;  %v815_v42 = vmax.f32 %v693_v54, %v1304_v61  ;;  %v1307_v43 = vadd.f32 %v1306_v8, %v1305_v1  ;;  %v1347_v10 = vadd.f32 %v1346_v9, %v1345_v2 }
 0x14f   : > { %v1179_v11 = vpack.c.bf16 %v959_v41, %v958_v3  ;;  %v937_v12 = vmax.f32 %v815_v42, %v1344_v0  ;;  %v816_v13 = vmax.f32 %v694_v57, %v1307_v43 }
 0x151   : > { %1191 = vst [vmem:[%s1811_s23 + $0x8] sm:$0xff] %v1179_v11   ;;  %v952_v14 = vadd.f32 %v1801_v21, %v937_v12  ;;  %v938_v15 = vmax.f32 %v816_v13, %v1347_v10  ;;  %v1308_v16 = vpop.f32.mrb[28].mxu0  ;;  %v1348_v17 = vpop.f32.mrb[28].mxu1 }
 0x152   : > { %v1309_v18 = vpop.f32.mrb[29].mxu0  ;;  %v1349_v19 = vpop.f32.mrb[29].mxu1 }
 0x153   : > { %v953_v48 = vadd.f32 %v1801_v21, %v938_v15  ;;  %v1310_v49 = vadd.f32 %v1309_v18, %v1308_v16  ;;  %v1350_v54 = vadd.f32 %v1349_v19, %v1348_v17  ;;  %v1311_v20 = vpop.f32.mrb[30].mxu0  ;;  %v1351_v22 = vpop.f32.mrb[30].mxu1  ;;  %v960_v23 = vmax.f32 %v952_v14, 0.0 }
 0x154   : > { %v1312_v24 = vpop.f32.mrb[31].mxu0  ;;  %v1352_v55 = vpop.f32.mrb[31].mxu1 }
 0x155   : > { %v961_v56 = vmax.f32 %v953_v48, 0.0  ;;  %v817_v57 = vmax.f32 %v695_v4, %v1310_v49  ;;  %v1313_v25 = vadd.f32 %v1312_v24, %v1311_v20  ;;  %v1353_v27 = vadd.f32 %v1352_v55, %v1351_v22 }
 0x157   : > { %v1184_v28 = vpack.c.bf16 %v961_v56, %v960_v23  ;;  %v939_v30 = vmax.f32 %v817_v57, %v1350_v54  ;;  %v818_v31 = vmax.f32 %v696_v7, %v1313_v25 }
 0x159   : > { %1192 = vst [vmem:[%s1811_s23 + $0x10] sm:$0xff] %v1184_v28   ;;  %v954_v26 = vadd.f32 %v1801_v21, %v939_v30  ;;  %v940_v32 = vmax.f32 %v818_v31, %v1353_v27 }
 0x15b   : > { %v955_v33 = vadd.f32 %v1801_v21, %v940_v32  ;;  %v962_v36 = vmax.f32 %v954_v26, 0.0 }
 0x15d   : > { %v963_v37 = vmax.f32 %v955_v33, 0.0 }
 0x15f   : > { %v1189_v38 = vpack.c.bf16 %v963_v37, %v962_v36 }
 0x161   : > { %1193 = vst [vmem:[%s1811_s23 + $0x18] sm:$0xff] %v1189_v38  }
 0x162 PF: > { %p10_p9 = scmp.ge.s32.totalorder %s1503_s16, 4   ;;  %s1852_s12 = smov %s1460_s13 }
 0x163   : > { %s1853_s13 = smov %s1512_s19  ;;  %s1854_s14 = smov %s1503_s16 }
 0x164   :  { %12 = sbr.rel (!%p10_p9) target bundleno = 2 (0x2), region = 108 }

// kernel: cnn_policy_forward.6
= control target key start
LH: loop header
LB: loop body
LE: loop exit
PB: predicated region body
PF: predicated region fallthrough
CT: control target
= control target key end

     0   :  { %s1335_s12 = smov 0   ;;  %s1337_s13 = smov 0   ;;  %s1678_s0 = inlined_call_operand.vmem [shape: bf16[4,32,384], index: 0, kind: input, shape index: {}]   ;;  %s1679_s1 = inlined_call_operand.vmem [shape: bf16[384,128], index: 1, kind: input, shape index: {}]   ;;  %s1680_s2 = inlined_call_operand.vmem [shape: f32[1,128], index: 2, kind: input, shape index: {}]   ;;  %s1681_s3 = inlined_call_operand.vmem [shape: bf16[32,128], index: 3, kind: output, shape index: {}]  }
   0x1   :  { %s1339_s14 = smov 0  }
   0x2 LB: > { %s930_s15 = sadd.s32 4294967295, %s1311_s14   ;;  %s1352_s16 = sadd.s32 1, %s1311_s14   ;;  %s1311_s14 = sphi %s1339_s14, %s1684_s14   ;;  %s1307_s13 = sphi %s1337_s13, %s1683_s13   ;;  %s1303_s12 = sphi %s1335_s12, %s1682_s12  }
   0x3   : > { %s17_s17 = ssub.s32 %s1311_s14, %s1352_s16  ;;  %s20_s18 = sadd.s32 1, %s1307_s13 }
   0x4   : > { %p18_p0 = scmp.eq.s32.totalorder %s17_s17, 0  ;;  %p27_p1 = scmp.ne.s32.totalorder %s1307_s13, %s1303_s12 }
   0x5   : > { %p28_p2 = scmp.eq.s32.totalorder %s1311_s14, 0  ;;  %p933_p4 = scmp.ge.s32.totalorder %s1311_s14, 2 }
   0x6   : > { %s1361_s19 = scalar_select %p18_p0, %s1307_s13, %s20_s18  }
   0x7   : > { %p29_p3 = por %p28_p2, %p27_p1  ;;  %127 = sbr.rel (%p933_p4) target bundleno = 28 (0x1c), region = 24 }
   0xe   : > { %130 = sbr.rel (!%p29_p3) target bundleno = 28 (0x1c), region = 28  ;;  %s132_s20 = sand.u32 (%p29_p3), 1, %s1307_s13  }
   0xf   : > { %s1221_s21 = smul.u32 (%p29_p3), 24, %s1311_s14 }
  0x10   : > { %s1220_s22 = smul.u32 (%p29_p3), 96, %s132_s20 }
  0x11   : > { %s1369_s25 = scalar_lea.vmem (%p29_p3), %s1678_s0, %s1221_s21 }
  0x12   : > { %v153_v0 = vld [vmem:[%s1369_s25] sm:$0xff] (%p29_p3)  ;;  %v155_v1 = vld [vmem:[%s1369_s25 + $0xc] sm:$0xff] (%p29_p3)  ;;  %s134_s26 = scalar_lea.vmem (%p29_p3), [#allocation2], %s1220_s22  ;;  %v937_v8 = vld [vmem:[%s1369_s25 + $0x8] sm:$0xf] (%p29_p3) }
  0x13   : > { %v157_v2 = vld [vmem:[%s1369_s25 + $0x30] sm:$0xff] (%p29_p3)  ;;  %154 = vst [vmem:[%s134_s26] sm:$0xff] (%p29_p3), %v153_v0  ;;  %156 = vst [vmem:[%s134_s26 + $0xc] sm:$0xff] (%p29_p3), %v155_v1  ;;  %v159_v3 = vld [vmem:[%s1369_s25 + $0x3c] sm:$0xff] (%p29_p3) }
  0x14   : > { %158 = vst [vmem:[%s134_s26 + $0x18] sm:$0xff] (%p29_p3), %v157_v2  ;;  %v161_v4 = vld [vmem:[%s1369_s25 + $0x60] sm:$0xff] (%p29_p3)  ;;  %v163_v5 = vld [vmem:[%s1369_s25 + $0x6c] sm:$0xff] (%p29_p3)  ;;  %160 = vst [vmem:[%s134_s26 + $0x24] sm:$0xff] (%p29_p3), %v159_v3 }
  0x15   : > { %162 = vst [vmem:[%s134_s26 + $0x30] sm:$0xff] %v161_v4  ;;  %164 = vst [vmem:[%s134_s26 + $0x3c] sm:$0xff] %v163_v5  ;;  %v165_v6 = vld [vmem:[%s1369_s25 + $0x90] sm:$0xff]  ;;  %v167_v7 = vld [vmem:[%s1369_s25 + $0x9c] sm:$0xff] }
  0x16   : > { %166 = vst [vmem:[%s134_s26 + $0x48] sm:$0xff] %v165_v6  ;;  %168 = vst [vmem:[%s134_s26 + $0x54] sm:$0xff] %v167_v7  ;;  %v939_v9 = vld [vmem:[%s1369_s25 + $0x14] sm:$0xf]  ;;  %v941_v10 = vld [vmem:[%s1369_s25 + $0x38] sm:$0xf] }
  0x17   : > { %938 = vst [vmem:[%s134_s26 + $0x8] sm:$0xf] %v937_v8  ;;  %v943_v11 = vld [vmem:[%s1369_s25 + $0x44] sm:$0xf]  ;;  %940 = vst [vmem:[%s134_s26 + $0x14] sm:$0xf] %v939_v9 }
  0x18   : > { %942 = vst [vmem:[%s134_s26 + $0x20] sm:$0xf] %v941_v10  ;;  %944 = vst [vmem:[%s134_s26 + $0x2c] sm:$0xf] %v943_v11  ;;  %v945_v12 = vld [vmem:[%s1369_s25 + $0x68] sm:$0xf] }
  0x19   : > { %v947_v13 = vld [vmem:[%s1369_s25 + $0x74] sm:$0xf]  ;;  %v949_v14 = vld [vmem:[%s1369_s25 + $0x98] sm:$0xf]  ;;  %946 = vst [vmem:[%s134_s26 + $0x38] sm:$0xf] %v945_v12 }
  0x1a   : > { %948 = vst [vmem:[%s134_s26 + $0x44] sm:$0xf] %v947_v13  ;;  %950 = vst [vmem:[%s134_s26 + $0x50] sm:$0xf] %v949_v14  ;;  %v951_v15 = vld [vmem:[%s1369_s25 + $0xa4] sm:$0xf] }
  0x1b   : > { %952 = vst [vmem:[%s134_s26 + $0x5c] sm:$0xf] %v951_v15 }
  0x1c PF: > { %p953_p5 = scmp.ge.s32.totalorder %s1311_s14, 1  ;;  %p196_p6 = scmp.lt.s32.totalorder %s1311_s14, 3 }
  0x1e   : > { %p197_p7 = pnand %p953_p5, %p196_p6 }
  0x1f   : > { %v1392_v16 = vld [vmem:[%s1679_s1 + $0x40] sm:$0xff] (!%p197_p7)   ;;  %v1313_v17 = vmov (!%p197_p7), 0.0   ;;  %v1410_v20 = vld [vmem:[%s1679_s1 + $0x48] sm:$0xff] (!%p197_p7)   ;;  %vm1314_vm0 = vmmov (!%p197_p7), 0   ;;  %v1430_v23 = vld [vmem:[%s1679_s1 + $0x50] sm:$0xff] (!%p197_p7)   ;;  %s203_s9 = sand.u32 (!%p197_p7), 1, %s1303_s12  }
  0x20   : > { %200 = sbr.rel (%p197_p7) target bundleno = 388 (0x184), region = 54  ;;  %1140 = vmatprep.subr.bf16.mxu1 (!%p197_p7), %v1313_v17  ;;  %v1398_v18 = vld [vmem:[%s1679_s1] sm:$0xff] (!%p197_p7)   ;;  %1016 = vmatprep.subr.bf16.mxu0 (!%p197_p7), %v1392_v16  ;;  %v1416_v21 = vld [vmem:[%s1679_s1 + $0x8] sm:$0xff] (!%p197_p7)   ;;  %v1436_v24 = vld [vmem:[%s1679_s1 + $0x10] sm:$0xff] (!%p197_p7)   ;;  %s954_s8 = sshll.u32 (!%p197_p7), %s930_s15, 1 }
  0x21   : > { %v1404_v19 = vld [vmem:[%s1679_s1 + $0x80] sm:$0xff] (!%p197_p7)   ;;  %1017 = vmatpush3.bf16.msra.mxu0 (!%p197_p7), %v1398_v18  ;;  %1156 = vmatprep.mubr.msk.bf16.mxu1 (!%p197_p7), %vm1314_vm0, %v1313_v17  ;;  %v1425_v22 = vld [vmem:[%s1679_s1 + $0x88] sm:$0xff] (!%p197_p7)   ;;  %v1443_v25 = vld [vmem:[%s1679_s1 + $0x90] sm:$0xff] (!%p197_p7)   ;;  %s1222_s20 = smul.u32 (!%p197_p7), 96, %s203_s9  ;;  %p228_p8 = scmp.lt.s32.totalorder (!%p197_p7), %s954_s8, 3 }
  0x22   : > { %1141 = vmatpush3.bf16.msra.mxu1 (!%p197_p7), %v1404_v19  ;;  %1018 = vmatprep.subr.bf16.mxu0 (!%p197_p7), %v1410_v20  ;;  %v1449_v26 = vld [vmem:[%s1679_s1 + $0x58] sm:$0xff] (!%p197_p7)   ;;  %v1467_v29 = vld [vmem:[%s1679_s1 + $0x60] sm:$0xff] (!%p197_p7)   ;;  %v1487_v32 = vld [vmem:[%s1679_s1 + $0x68] sm:$0xff] (!%p197_p7)  }
  0x23   : > { %1142 = vmatprep.subr.bf16.mxu1 (!%p197_p7), %v1313_v17  ;;  %v1454_v27 = vld [vmem:[%s1679_s1 + $0x18] sm:$0xff] (!%p197_p7)   ;;  %v1473_v30 = vld [vmem:[%s1679_s1 + $0x20] sm:$0xff] (!%p197_p7)   ;;  %v1493_v33 = vld [vmem:[%s1679_s1 + $0x28] sm:$0xff] (!%p197_p7)   ;;  %s1527_s30 = scalar_lea.vmem (!%p197_p7), [#allocation2], %s1222_s20 }
  0x24   : > { %v1460_v28 = vld [vmem:[%s1679_s1 + $0x98] sm:$0xff] (!%p197_p7)   ;;  %v1479_v31 = vld [vmem:[%s1679_s1 + $0xa0] sm:$0xff] (!%p197_p7)   ;;  %v1499_v34 = vld [vmem:[%s1679_s1 + $0xa8] sm:$0xff] (!%p197_p7)  }
  0x25   : > { %1019 = vmatpush3.bf16.msra.mxu0 (!%p197_p7), %v1416_v21  ;;  %v1506_v35 = vld [vmem:[%s1679_s1 + $0x70] sm:$0xff] (!%p197_p7)   ;;  %v1525_v38 = vld [vmem:[%s1679_s1 + $0x78] sm:$0xff] (!%p197_p7)   ;;  %v1273_v42 = vld [vmem:[%s1527_s30] ss:$12 sps:$4 sm:$0xff] (!%p197_p7)  }
  0x26   : > { %1143 = vmatpush3.bf16.msra.mxu1 (!%p197_p7), %v1425_v22  ;;  %1020 = vmatprep.subr.bf16.mxu0 (!%p197_p7), %v1430_v23  ;;  %v1512_v36 = vld [vmem:[%s1679_s1 + $0x30] sm:$0xff] (!%p197_p7)   ;;  %v1535_v40 = vld [vmem:[%s1679_s1 + $0x38] sm:$0xff] (!%p197_p7)   ;;  %v1280_v46 = vld [vmem:[%s1527_s30 + $0x20] ss:$12 sps:$4 sm:$0xff] (!%p197_p7)  }
  0x27   : > { %1144 = vmatprep.subr.bf16.mxu1 %v1313_v17  ;;  %v1518_v37 = vld [vmem:[%s1679_s1 + $0xb0] sm:$0xff]   ;;  %v1542_v41 = vld [vmem:[%s1679_s1 + $0xb8] sm:$0xff]   ;;  %s1686_s8 = smov (!%p228_p8, %s954_s8), 3 }
  0x28   : > { %v1275_v39 = vld [vmem:[%s1527_s30 + $0x4] ss:$12 sps:$4 sm:$0xff]   ;;  %v1276_v43 = vld [vmem:[%s1527_s30 + $0x8] ss:$12 sps:$4 sm:$0xff]   ;;  %v1287_v50 = vld [vmem:[%s1527_s30 + $0x4c] ss:$12 sps:$4 sm:$0xff]  }
  0x29   : > { %1021 = vmatpush3.bf16.msra.mxu0 %v1436_v24  ;;  %478 = vmatprep.mubr.bf16.mxu0 %v1275_v39  ;;  %v1279_v44 = vld [vmem:[%s1527_s30 + $0x1c] ss:$12 sps:$4 sm:$0xff]   ;;  %v1277_v45 = vld [vmem:[%s1527_s30 + $0x18] ss:$12 sps:$4 sm:$0xff]   ;;  %v1283_v47 = vld [vmem:[%s1527_s30 + $0x34] ss:$12 sps:$4 sm:$0xff]  }
  0x2a   : > { %1145 = vmatpush3.bf16.msra.mxu1 %v1443_v25  ;;  %1022 = vmatprep.subr.bf16.mxu0 %v1449_v26  ;;  %v1281_v48 = vld [vmem:[%s1527_s30 + $0x30] ss:$12 sps:$4 sm:$0xff]   ;;  %v1284_v49 = vld [vmem:[%s1527_s30 + $0x38] ss:$12 sps:$4 sm:$0xff]   ;;  %v1285_v51 = vld [vmem:[%s1527_s30 + $0x48] ss:$12 sps:$4 sm:$0xff]  }
  0x2b   : > { %1146 = vmatprep.subr.bf16.mxu1 %v1313_v17  ;;  %v1288_v52 = vld [vmem:[%s1527_s30 + $0x50] ss:$12 sps:$4 sm:$0xff]   ;;  %s955_s14 = sshll.u32 %s1686_s8, 2 }
  0x2c   : > { %s231_s17 = scalar_lea.vmem %s1681_s3, %s955_s14 }
  0x2d   : > { %1023 = vmatpush3.bf16.msra.mxu0 %v1454_v27 }
  0x2e   : > { %1147 = vmatpush3.bf16.msra.mxu1 %v1460_v28  ;;  %1024 = vmatprep.subr.bf16.mxu0 %v1467_v29 }
  0x2f   : > { %1148 = vmatprep.subr.bf16.mxu1 %v1313_v17 }
  0x31   : > { %1025 = vmatpush3.bf16.msra.mxu0 %v1473_v30 }
  0x32   : > { %1149 = vmatpush3.bf16.msra.mxu1 %v1479_v31  ;;  %1026 = vmatprep.subr.bf16.mxu0 %v1487_v32 }
  0x33   : > { %1150 = vmatprep.subr.bf16.mxu1 %v1313_v17 }
  0x35   : > { %1027 = vmatpush3.bf16.msra.mxu0 %v1493_v33 }
  0x36   : > { %1151 = vmatpush3.bf16.msra.mxu1 %v1499_v34  ;;  %1028 = vmatprep.subr.bf16.mxu0 %v1506_v35 }
  0x37   : > { %1152 = vmatprep.subr.bf16.mxu1 %v1313_v17 }
  0x39   : > { %1029 = vmatpush3.bf16.msra.mxu0 %v1512_v36 }
  0x3a   : > { %1153 = vmatpush3.bf16.msra.mxu1 %v1518_v37  ;;  %1030 = vmatprep.subr.bf16.mxu0 %v1525_v38 }
  0x3b   : > { %1154 = vmatprep.subr.bf16.mxu1 %v1313_v17 }
  0x3d   : > { %1031 = vmatpush3.bf16.msra.mxu0 %v1535_v40 }
  0x3e   : > { %1155 = vmatpush3.bf16.msra.mxu1 %v1542_v41  ;;  %1047 = vmatprep.subr.bf16.mxu0 %v1392_v16 }
  0x3f   : > { %1160 = vmatprep.subr.bf16.mxu1 %v1313_v17 }
  0x40   : > { %479 = vmatmul.mubr.bf16.vlgmr.msra.gmra.mrb[0].mxu0 %v1273_v42 }
  0x41   : > { %1157 = vmatmul.mubr.bf16.vlgmr.msra.gmra.mrb[0].mxu1 %v1276_v43  ;;  %1048 = vmatpush3.bf16.msra.mxu0 %v1398_v18 }
  0x42   : > { %1161 = vmatpush3.bf16.msra.mxu1 %v1404_v19  ;;  %1049 = vmatprep.subr.bf16.mxu0 %v1410_v20 }
  0x43   : > { %1162 = vmatprep.subr.bf16.mxu1 %v1313_v17  ;;  %581 = vmatprep.mubr.bf16.mxu0 %v1279_v44 }
  0x44   : > { %1176 = vmatprep.mubr.msk.bf16.mxu1 %vm1314_vm0, %v1313_v17 }
  0x45   : > { %1050 = vmatpush3.bf16.msra.mxu0 %v1416_v21 }
  0x46   : > { %1163 = vmatpush3.bf16.msra.mxu1 %v1425_v22  ;;  %1051 = vmatprep.subr.bf16.mxu0 %v1430_v23 }
  0x47   : > { %1164 = vmatprep.subr.bf16.mxu1 %v1313_v17 }
  0x49   : > { %1052 = vmatpush3.bf16.msra.mxu0 %v1436_v24 }
  0x4a   : > { %1165 = vmatpush3.bf16.msra.mxu1 %v1443_v25  ;;  %1053 = vmatprep.subr.bf16.mxu0 %v1449_v26 }
  0x4b   : > { %1166 = vmatprep.subr.bf16.mxu1 %v1313_v17 }
  0x4d   : > { %1054 = vmatpush3.bf16.msra.mxu0 %v1454_v27 }
  0x4e   : > { %1167 = vmatpush3.bf16.msra.mxu1 %v1460_v28  ;;  %1055 = vmatprep.subr.bf16.mxu0 %v1467_v29 }
  0x4f   : > { %1168 = vmatprep.subr.bf16.mxu1 %v1313_v17 }
  0x51   : > { %1056 = vmatpush3.bf16.msra.mxu0 %v1473_v30 }
  0x52   : > { %1169 = vmatpush3.bf16.msra.mxu1 %v1479_v31  ;;  %1057 = vmatprep.subr.bf16.mxu0 %v1487_v32 }
  0x53   : > { %1170 = vmatprep.subr.bf16.mxu1 %v1313_v17 }
  0x55   : > { %1058 = vmatpush3.bf16.msra.mxu0 %v1493_v33 }
  0x56   : > { %1171 = vmatpush3.bf16.msra.mxu1 %v1499_v34  ;;  %1059 = vmatprep.subr.bf16.mxu0 %v1506_v35 }
  0x57   : > { %1172 = vmatprep.subr.bf16.mxu1 %v1313_v17 }
  0x59   : > { %1060 = vmatpush3.bf16.msra.mxu0 %v1512_v36 }
  0x5a   : > { %1173 = vmatpush3.bf16.msra.mxu1 %v1518_v37  ;;  %1061 = vmatprep.subr.bf16.mxu0 %v1525_v38 }
  0x5b   : > { %1174 = vmatprep.subr.bf16.mxu1 %v1313_v17 }
  0x5d   : > { %1062 = vmatpush3.bf16.msra.mxu0 %v1535_v40 }
  0x5e   : > { %1175 = vmatpush3.bf16.msra.mxu1 %v1542_v41  ;;  %1078 = vmatprep.subr.bf16.mxu0 %v1392_v16 }
  0x5f   : > { %1180 = vmatprep.subr.bf16.mxu1 %v1313_v17 }
  0x60   : > { %582 = vmatmul.mubr.bf16.vlgmr.msra.gmra.mrb[4].mxu0 %v1277_v45 }
  0x61   : > { %1177 = vmatmul.mubr.bf16.vlgmr.msra.gmra.mrb[4].mxu1 %v1280_v46  ;;  %1079 = vmatpush3.bf16.msra.mxu0 %v1398_v18 }
  0x62   : > { %1181 = vmatpush3.bf16.msra.mxu1 %v1404_v19  ;;  %1080 = vmatprep.subr.bf16.mxu0 %v1410_v20 }
  0x63   : > { %1182 = vmatprep.subr.bf16.mxu1 %v1313_v17  ;;  %686 = vmatprep.mubr.bf16.mxu0 %v1283_v47 }
  0x64   : > { %1196 = vmatprep.mubr.msk.bf16.mxu1 %vm1314_vm0, %v1313_v17 }
  0x65   : > { %1081 = vmatpush3.bf16.msra.mxu0 %v1416_v21 }
  0x66   : > { %1183 = vmatpush3.bf16.msra.mxu1 %v1425_v22  ;;  %1082 = vmatprep.subr.bf16.mxu0 %v1430_v23 }
  0x67   : > { %1184 = vmatprep.subr.bf16.mxu1 %v1313_v17 }
  0x69   : > { %1083 = vmatpush3.bf16.msra.mxu0 %v1436_v24 }
  0x6a   : > { %1185 = vmatpush3.bf16.msra.mxu1 %v1443_v25  ;;  %1084 = vmatprep.subr.bf16.mxu0 %v1449_v26 }
  0x6b   : > { %1186 = vmatprep.subr.bf16.mxu1 %v1313_v17 }
  0x6d   : > { %1085 = vmatpush3.bf16.msra.mxu0 %v1454_v27 }
  0x6e   : > { %1187 = vmatpush3.bf16.msra.mxu1 %v1460_v28  ;;  %1086 = vmatprep.subr.bf16.mxu0 %v1467_v29 }
  0x6f   : > { %1188 = vmatprep.subr.bf16.mxu1 %v1313_v17 }
  0x71   : > { %1087 = vmatpush3.bf16.msra.mxu0 %v1473_v30 }
  0x72   : > { %1189 = vmatpush3.bf16.msra.mxu1 %v1479_v31  ;;  %1088 = vmatprep.subr.bf16.mxu0 %v1487_v32 }
  0x73   : > { %1190 = vmatprep.subr.bf16.mxu1 %v1313_v17 }
  0x75   : > { %1089 = vmatpush3.bf16.msra.mxu0 %v1493_v33 }
  0x76   : > { %1191 = vmatpush3.bf16.msra.mxu1 %v1499_v34  ;;  %1090 = vmatprep.subr.bf16.mxu0 %v1506_v35 }
  0x77   : > { %1192 = vmatprep.subr.bf16.mxu1 %v1313_v17 }
  0x79   : > { %1091 = vmatpush3.bf16.msra.mxu0 %v1512_v36 }
  0x7a   : > { %1193 = vmatpush3.bf16.msra.mxu1 %v1518_v37  ;;  %1092 = vmatprep.subr.bf16.mxu0 %v1525_v38 }
  0x7b   : > { %1194 = vmatprep.subr.bf16.mxu1 %v1313_v17 }
  0x7d   : > { %1093 = vmatpush3.bf16.msra.mxu0 %v1535_v40 }
  0x7e   : > { %1195 = vmatpush3.bf16.msra.mxu1 %v1542_v41  ;;  %1109 = vmatprep.subr.bf16.mxu0 %v1392_v16 }
  0x7f   : > { %1200 = vmatprep.subr.bf16.mxu1 %v1313_v17 }
  0x80   : > { %687 = vmatmul.mubr.bf16.vlgmr.msra.gmra.mrb[8].mxu0 %v1281_v48 }
  0x81   : > { %1197 = vmatmul.mubr.bf16.vlgmr.msra.gmra.mrb[8].mxu1 %v1284_v49  ;;  %1110 = vmatpush3.bf16.msra.mxu0 %v1398_v18 }
  0x82   : > { %1201 = vmatpush3.bf16.msra.mxu1 %v1404_v19  ;;  %1111 = vmatprep.subr.bf16.mxu0 %v1410_v20 }
  0x83   : > { %1202 = vmatprep.subr.bf16.mxu1 %v1313_v17  ;;  %791 = vmatprep.mubr.bf16.mxu0 %v1287_v50 }
  0x84   : > { %1216 = vmatprep.mubr.msk.bf16.mxu1 %vm1314_vm0, %v1313_v17 }
  0x85   : > { %1112 = vmatpush3.bf16.msra.mxu0 %v1416_v21 }
  0x86   : > { %1203 = vmatpush3.bf16.msra.mxu1 %v1425_v22  ;;  %1113 = vmatprep.subr.bf16.mxu0 %v1430_v23 }
  0x87   : > { %1204 = vmatprep.subr.bf16.mxu1 %v1313_v17 }
  0x89   : > { %1114 = vmatpush3.bf16.msra.mxu0 %v1436_v24 }
  0x8a   : > { %1205 = vmatpush3.bf16.msra.mxu1 %v1443_v25  ;;  %1115 = vmatprep.subr.bf16.mxu0 %v1449_v26 }
  0x8b   : > { %1206 = vmatprep.subr.bf16.mxu1 %v1313_v17 }
  0x8d   : > { %1116 = vmatpush3.bf16.msra.mxu0 %v1454_v27 }
  0x8e   : > { %1207 = vmatpush3.bf16.msra.mxu1 %v1460_v28  ;;  %1117 = vmatprep.subr.bf16.mxu0 %v1467_v29 }
  0x8f   : > { %1208 = vmatprep.subr.bf16.mxu1 %v1313_v17 }
  0x91   : > { %1118 = vmatpush3.bf16.msra.mxu0 %v1473_v30 }
  0x92   : > { %1209 = vmatpush3.bf16.msra.mxu1 %v1479_v31  ;;  %1119 = vmatprep.subr.bf16.mxu0 %v1487_v32 }
  0x93   : > { %1210 = vmatprep.subr.bf16.mxu1 %v1313_v17 }
  0x95   : > { %1120 = vmatpush3.bf16.msra.mxu0 %v1493_v33 }
  0x96   : > { %1211 = vmatpush3.bf16.msra.mxu1 %v1499_v34  ;;  %1121 = vmatprep.subr.bf16.mxu0 %v1506_v35 }
  0x97   : > { %1212 = vmatprep.subr.bf16.mxu1 %v1313_v17 }
  0x99   : > { %1122 = vmatpush3.bf16.msra.mxu0 %v1512_v36 }
  0x9a   : > { %1213 = vmatpush3.bf16.msra.mxu1 %v1518_v37  ;;  %1123 = vmatprep.subr.bf16.mxu0 %v1525_v38 }
  0x9b   : > { %1214 = vmatprep.subr.bf16.mxu1 %v1313_v17 }
  0x9d   : > { %1124 = vmatpush3.bf16.msra.mxu0 %v1535_v40  ;;  %v1004_v40 = vld [vmem:[%s1680_s2] ss:$0 sm:$0xff] }
  0x9e   : > { %1215 = vmatpush3.bf16.msra.mxu1 %v1542_v41 }
  0xa0   : > { %792 = vmatmul.mubr.bf16.vlgmr.msra.gmra.mrb[12].mxu0 %v1285_v51 }
  0xa1   : > { %1217 = vmatmul.mubr.bf16.vlgmr.msra.gmra.mrb[12].mxu1 %v1288_v52 }
 0x113   : > { %v1032_v53 = vpop.f32.mrb[0].mxu0 }
 0x114   : > { %v1033_v54 = vpop.f32.mrb[1].mxu0  ;;  %v521_v55 = vpop.f32.mrb[0].mxu1 }
 0x115   : > { %v1034_v56 = vadd.f32 %v1033_v54, %v1032_v53  ;;  %v1035_v57 = vpop.f32.mrb[2].mxu0  ;;  %v1158_v58 = vpop.f32.mrb[1].mxu1 }
 0x116   : > { %v1036_v59 = vpop.f32.mrb[3].mxu0  ;;  %v524_v60 = vpop.f32.mrb[2].mxu1 }
 0x117   : > { %v522_v61 = vadd.f32 %v1034_v56, %v521_v55  ;;  %v1037_v62 = vadd.f32 %v1036_v59, %v1035_v57  ;;  %v1159_v63 = vpop.f32.mrb[3].mxu1 }
 0x119   : > { %v525_v0 = vadd.f32 %v1037_v62, %v524_v60 }
 0x133   : > { %v1063_v1 = vpop.f32.mrb[4].mxu0 }
 0x134   : > { %v1064_v2 = vpop.f32.mrb[5].mxu0  ;;  %v624_v3 = vpop.f32.mrb[4].mxu1 }
 0x135   : > { %v1065_v4 = vadd.f32 %v1064_v2, %v1063_v1  ;;  %v1066_v5 = vpop.f32.mrb[6].mxu0  ;;  %v1178_v6 = vpop.f32.mrb[5].mxu1 }
 0x136   : > { %v1067_v7 = vpop.f32.mrb[7].mxu0  ;;  %v627_v8 = vpop.f32.mrb[6].mxu1 }
 0x137   : > { %v625_v9 = vadd.f32 %v1065_v4, %v624_v3  ;;  %v1068_v10 = vadd.f32 %v1067_v7, %v1066_v5  ;;  %v1179_v11 = vpop.f32.mrb[7].mxu1 }
 0x139   : > { %v631_v12 = vmax.f32 %v522_v61, %v625_v9  ;;  %v628_v13 = vadd.f32 %v1068_v10, %v627_v8 }
 0x13b   : > { %v632_v14 = vmax.f32 %v525_v0, %v628_v13 }
 0x153   : > { %v1094_v15 = vpop.f32.mrb[8].mxu0 }
 0x154   : > { %v1095_v16 = vpop.f32.mrb[9].mxu0  ;;  %v729_v17 = vpop.f32.mrb[8].mxu1 }
 0x155   : > { %v1096_v18 = vadd.f32 %v1095_v16, %v1094_v15  ;;  %v1097_v19 = vpop.f32.mrb[10].mxu0  ;;  %v1198_v20 = vpop.f32.mrb[9].mxu1 }
 0x156   : > { %v1098_v21 = vpop.f32.mrb[11].mxu0  ;;  %v732_v22 = vpop.f32.mrb[10].mxu1 }
 0x157   : > { %v730_v23 = vadd.f32 %v1096_v18, %v729_v17  ;;  %v1099_v24 = vadd.f32 %v1098_v21, %v1097_v19  ;;  %v1199_v25 = vpop.f32.mrb[11].mxu1 }
 0x159   : > { %v736_v26 = vmax.f32 %v631_v12, %v730_v23  ;;  %v733_v27 = vadd.f32 %v1099_v24, %v732_v22 }
 0x15b   : > { %v737_v28 = vmax.f32 %v632_v14, %v733_v27 }
 0x173   : > { %v1125_v29 = vpop.f32.mrb[12].mxu0 }
 0x174   : > { %v834_v30 = vpop.f32.mrb[12].mxu1  ;;  %v1126_v31 = vpop.f32.mrb[13].mxu0 }
 0x175   : > { %v1127_v32 = vadd.f32 %v1126_v31, %v1125_v29  ;;  %v1218_v33 = vpop.f32.mrb[13].mxu1  ;;  %v1128_v34 = vpop.f32.mrb[14].mxu0 }
 0x176   : > { %v837_v35 = vpop.f32.mrb[14].mxu1  ;;  %v1129_v36 = vpop.f32.mrb[15].mxu0 }
 0x177   : > { %v835_v37 = vadd.f32 %v1127_v32, %v834_v30  ;;  %v1130_v38 = vadd.f32 %v1129_v36, %v1128_v34  ;;  %v1219_v39 = vpop.f32.mrb[15].mxu1 }
 0x179   : > { %v841_v41 = vmax.f32 %v736_v26, %v835_v37  ;;  %v838_v42 = vadd.f32 %v1130_v38, %v837_v35 }
 0x17b   : > { %v850_v43 = vadd.f32 %v1004_v40, %v841_v41  ;;  %v842_v44 = vmax.f32 %v737_v28, %v838_v42 }
 0x17d   : > { %v851_v45 = vadd.f32 %v1004_v40, %v842_v44  ;;  %v852_v46 = vmax.f32 %v850_v43, 0.0 }
 0x17f   : > { %v853_v47 = vmax.f32 %v851_v45, 0.0 }
 0x181   : > { %v1014_v48 = vpack.c.bf16 %v853_v47, %v852_v46 }
 0x183   : > { %1015 = vst [vmem:[%s231_s17] sm:$0xff] %v1014_v48  }
 0x184 PF: > { %p10_p9 = scmp.ge.s32.totalorder %s1352_s16, 4   ;;  %s1682_s12 = smov %s1307_s13 }
 0x185   : > { %s1683_s13 = smov %s1361_s19  ;;  %s1684_s14 = smov %s1352_s16 }
 0x186   :  { %12 = sbr.rel (!%p10_p9) target bundleno = 2 (0x2), region = 102 }

// kernel: cnn_policy_forward.7
= control target key start
LH: loop header
LB: loop body
LE: loop exit
PB: predicated region body
PF: predicated region fallthrough
CT: control target
= control target key end

     0   :  { %s2079_s1 = inlined_call_operand.vmem [shape: bf16[1024,256], index: 1, kind: input, shape index: {}]   ;;  %s2080_s0 = inlined_call_operand.vmem [shape: bf16[8,1024], index: 0, kind: input, shape index: {}]   ;;  %s2081_s3 = inlined_call_operand.vmem [shape: bf16[256,128], index: 3, kind: input, shape index: {}]   ;;  %s2082_s2 = inlined_call_operand.vmem [shape: f32[1,256], index: 2, kind: input, shape index: {}]   ;;  %s2083_s4 = inlined_call_operand.vmem [shape: f32[1,128], index: 4, kind: input, shape index: {}]   ;;  %s2084_s5 = inlined_call_operand.vmem [shape: f32[8,128], index: 5, kind: output, shape index: {}]  }
   0x1   :  { %v1368_v0 = vld [vmem:[%s2079_s1 + $0x4] ss:$8 sps:$4 sm:$0xff]   ;;  %v1372_v2 = vld [vmem:[%s2079_s1] ss:$8 sps:$4 sm:$0xff]   ;;  %v1374_v4 = vld [vmem:[%s2079_s1 + $0x14] ss:$8 sps:$4 sm:$0xff]  }
   0x2   :  { %v1370_v1 = vld [vmem:[%s2079_s1 + $0x204] ss:$8 sps:$4 sm:$0xff]   ;;  %833 = vmatprep.subr.bf16.mxu1 %v1368_v0  ;;  %v1373_v3 = vld [vmem:[%s2079_s1 + $0x200] ss:$8 sps:$4 sm:$0xff]   ;;  %v1376_v5 = vld [vmem:[%s2079_s1 + $0x214] ss:$8 sps:$4 sm:$0xff]  }
   0x3   :  { %915 = vmatprep.subr.bf16.mxu0 %v1370_v1  ;;  %834 = vmatpush1.bf16.msra.mxu1 %v1372_v2  ;;  %v1378_v6 = vld [vmem:[%s2079_s1 + $0x10] ss:$8 sps:$4 sm:$0xff]   ;;  %v1380_v8 = vld [vmem:[%s2079_s1 + $0x24] ss:$8 sps:$4 sm:$0xff]   ;;  %v1384_v10 = vld [vmem:[%s2079_s1 + $0x20] ss:$8 sps:$4 sm:$0xff]  }
   0x4   :  { %916 = vmatpush1.bf16.msra.mxu0 %v1373_v3  ;;  %835 = vmatprep.subr.bf16.mxu1 %v1374_v4  ;;  %v1379_v7 = vld [vmem:[%s2079_s1 + $0x210] ss:$8 sps:$4 sm:$0xff]   ;;  %v1382_v9 = vld [vmem:[%s2079_s1 + $0x224] ss:$8 sps:$4 sm:$0xff]   ;;  %v1385_v11 = vld [vmem:[%s2079_s1 + $0x220] ss:$8 sps:$4 sm:$0xff]  }
   0x5   :  { %917 = vmatprep.subr.bf16.mxu0 %v1376_v5  ;;  %v1386_v12 = vld [vmem:[%s2079_s1 + $0x34] ss:$8 sps:$4 sm:$0xff]   ;;  %v1390_v14 = vld [vmem:[%s2079_s1 + $0x30] ss:$8 sps:$4 sm:$0xff]   ;;  %v1392_v16 = vld [vmem:[%s2079_s1 + $0x44] ss:$8 sps:$4 sm:$0xff]  }
   0x6   :  { %v1388_v13 = vld [vmem:[%s2079_s1 + $0x234] ss:$8 sps:$4 sm:$0xff]   ;;  %v1391_v15 = vld [vmem:[%s2079_s1 + $0x230] ss:$8 sps:$4 sm:$0xff]   ;;  %v1394_v17 = vld [vmem:[%s2079_s1 + $0x244] ss:$8 sps:$4 sm:$0xff]  }
   0x7   :  { %836 = vmatpush1.bf16.msra.mxu1 %v1378_v6  ;;  %v1396_v18 = vld [vmem:[%s2079_s1 + $0x40] ss:$8 sps:$4 sm:$0xff]   ;;  %v1398_v20 = vld [vmem:[%s2079_s1 + $0x54] ss:$8 sps:$4 sm:$0xff]   ;;  %v1402_v22 = vld [vmem:[%s2079_s1 + $0x50] ss:$8 sps:$4 sm:$0xff]  }
   0x8   :  { %918 = vmatpush1.bf16.msra.mxu0 %v1379_v7  ;;  %837 = vmatprep.subr.bf16.mxu1 %v1380_v8  ;;  %v1397_v19 = vld [vmem:[%s2079_s1 + $0x240] ss:$8 sps:$4 sm:$0xff]   ;;  %v1400_v21 = vld [vmem:[%s2079_s1 + $0x254] ss:$8 sps:$4 sm:$0xff]   ;;  %v1403_v23 = vld [vmem:[%s2079_s1 + $0x250] ss:$8 sps:$4 sm:$0xff]  }
   0x9   :  { %919 = vmatprep.subr.bf16.mxu0 %v1382_v9  ;;  %v1404_v24 = vld [vmem:[%s2079_s1 + $0x64] ss:$8 sps:$4 sm:$0xff]   ;;  %v1408_v26 = vld [vmem:[%s2079_s1 + $0x60] ss:$8 sps:$4 sm:$0xff]   ;;  %v1410_v28 = vld [vmem:[%s2079_s1 + $0x74] ss:$8 sps:$4 sm:$0xff]  }
   0xa   :  { %v1406_v25 = vld [vmem:[%s2079_s1 + $0x264] ss:$8 sps:$4 sm:$0xff]   ;;  %v1409_v27 = vld [vmem:[%s2079_s1 + $0x260] ss:$8 sps:$4 sm:$0xff]   ;;  %v1412_v29 = vld [vmem:[%s2079_s1 + $0x274] ss:$8 sps:$4 sm:$0xff]  }
   0xb   :  { %838 = vmatpush1.bf16.msra.mxu1 %v1384_v10  ;;  %v1414_v30 = vld [vmem:[%s2079_s1 + $0x70] ss:$8 sps:$4 sm:$0xff]   ;;  %v1416_v32 = vld [vmem:[%s2079_s1 + $0x84] ss:$8 sps:$4 sm:$0xff]   ;;  %v1420_v34 = vld [vmem:[%s2079_s1 + $0x80] ss:$8 sps:$4 sm:$0xff]  }
   0xc   :  { %920 = vmatpush1.bf16.msra.mxu0 %v1385_v11  ;;  %839 = vmatprep.subr.bf16.mxu1 %v1386_v12  ;;  %v1415_v31 = vld [vmem:[%s2079_s1 + $0x270] ss:$8 sps:$4 sm:$0xff]   ;;  %v1418_v33 = vld [vmem:[%s2079_s1 + $0x284] ss:$8 sps:$4 sm:$0xff]   ;;  %v1421_v35 = vld [vmem:[%s2079_s1 + $0x280] ss:$8 sps:$4 sm:$0xff]  }
   0xd   :  { %921 = vmatprep.subr.bf16.mxu0 %v1388_v13  ;;  %v1422_v36 = vld [vmem:[%s2079_s1 + $0x94] ss:$8 sps:$4 sm:$0xff]   ;;  %v1426_v38 = vld [vmem:[%s2079_s1 + $0x90] ss:$8 sps:$4 sm:$0xff]   ;;  %v1428_v40 = vld [vmem:[%s2079_s1 + $0xa4] ss:$8 sps:$4 sm:$0xff]  }
   0xe   :  { %v1424_v37 = vld [vmem:[%s2079_s1 + $0x294] ss:$8 sps:$4 sm:$0xff]   ;;  %v1427_v39 = vld [vmem:[%s2079_s1 + $0x290] ss:$8 sps:$4 sm:$0xff]   ;;  %v1430_v41 = vld [vmem:[%s2079_s1 + $0x2a4] ss:$8 sps:$4 sm:$0xff]  }
   0xf   :  { %840 = vmatpush1.bf16.msra.mxu1 %v1390_v14  ;;  %v1432_v42 = vld [vmem:[%s2079_s1 + $0xa0] ss:$8 sps:$4 sm:$0xff]   ;;  %v1434_v44 = vld [vmem:[%s2079_s1 + $0xb4] ss:$8 sps:$4 sm:$0xff]   ;;  %v1438_v47 = vld [vmem:[%s2079_s1 + $0xb0] ss:$8 sps:$4 sm:$0xff]  }
  0x10   :  { %922 = vmatpush1.bf16.msra.mxu0 %v1391_v15  ;;  %841 = vmatprep.subr.bf16.mxu1 %v1392_v16  ;;  %v1433_v43 = vld [vmem:[%s2079_s1 + $0x2a0] ss:$8 sps:$4 sm:$0xff]   ;;  %v1436_v45 = vld [vmem:[%s2079_s1 + $0x2b4] ss:$8 sps:$4 sm:$0xff]   ;;  %v1439_v49 = vld [vmem:[%s2079_s1 + $0x2b0] ss:$8 sps:$4 sm:$0xff]  }
  0x11   :  { %923 = vmatprep.subr.bf16.mxu0 %v1394_v17  ;;  %v21_v46 = vld [vmem:[%s2080_s0] sm:$0xff]  ;;  %v23_v50 = vld [vmem:[%s2080_s0 + $0x10] sm:$0xff] }
  0x12   :  { %v1182_v48 = vcombine.high %v21_v46, %v21_v46  ;;  %v1440_v51 = vld [vmem:[%s2079_s1 + $0xc4] ss:$8 sps:$4 sm:$0xff]   ;;  %v1186_v53 = vcombine.high %v23_v50, %v23_v50  ;;  %v1444_v54 = vld [vmem:[%s2079_s1 + $0xc0] ss:$8 sps:$4 sm:$0xff]   ;;  %v1446_v56 = vld [vmem:[%s2079_s1 + $0xd4] ss:$8 sps:$4 sm:$0xff]   ;;  %v1181_v6 = vcombine.low %v21_v46, %v21_v46  ;;  %v1185_v7 = vcombine.low %v23_v50, %v23_v50 }
  0x13   :  { %842 = vmatpush1.bf16.msra.mxu1 %v1396_v18  ;;  %v1442_v52 = vld [vmem:[%s2079_s1 + $0x2c4] ss:$8 sps:$4 sm:$0xff]   ;;  %v1445_v55 = vld [vmem:[%s2079_s1 + $0x2c0] ss:$8 sps:$4 sm:$0xff]   ;;  %v1448_v57 = vld [vmem:[%s2079_s1 + $0x2d4] ss:$8 sps:$4 sm:$0xff]  }
  0x14   :  { %924 = vmatpush1.bf16.msra.mxu0 %v1397_v19  ;;  %843 = vmatprep.subr.bf16.mxu1 %v1398_v20  ;;  %v1450_v58 = vld [vmem:[%s2079_s1 + $0xd0] ss:$8 sps:$4 sm:$0xff]   ;;  %v1452_v60 = vld [vmem:[%s2079_s1 + $0xe4] ss:$8 sps:$4 sm:$0xff]   ;;  %v1456_v62 = vld [vmem:[%s2079_s1 + $0xe0] ss:$8 sps:$4 sm:$0xff]  }
  0x15   :  { %925 = vmatprep.subr.bf16.mxu0 %v1400_v21  ;;  %865 = vmatprep.mubr.bf16.mxu1 %v1182_v48  ;;  %v1451_v59 = vld [vmem:[%s2079_s1 + $0x2d0] ss:$8 sps:$4 sm:$0xff]   ;;  %v1454_v61 = vld [vmem:[%s2079_s1 + $0x2e4] ss:$8 sps:$4 sm:$0xff]   ;;  %v1457_v63 = vld [vmem:[%s2079_s1 + $0x2e0] ss:$8 sps:$4 sm:$0xff]  }
  0x16   :  { %947 = vmatprep.mubr.bf16.mxu0 %v1186_v53  ;;  %v1458_v0 = vld [vmem:[%s2079_s1 + $0xf4] ss:$8 sps:$4 sm:$0xff]   ;;  %v1462_v2 = vld [vmem:[%s2079_s1 + $0xf0] ss:$8 sps:$4 sm:$0xff]   ;;  %v1468_v4 = vld [vmem:[%s2079_s1 + $0x104] ss:$8 sps:$4 sm:$0xff]  }
  0x17   :  { %844 = vmatpush1.bf16.msra.mxu1 %v1402_v22  ;;  %v1460_v1 = vld [vmem:[%s2079_s1 + $0x2f4] ss:$8 sps:$4 sm:$0xff]   ;;  %v1463_v3 = vld [vmem:[%s2079_s1 + $0x2f0] ss:$8 sps:$4 sm:$0xff]   ;;  %v1473_v5 = vld [vmem:[%s2079_s1 + $0x304] ss:$8 sps:$4 sm:$0xff]  }
  0x18   :  { %926 = vmatpush1.bf16.msra.mxu0 %v1403_v23  ;;  %845 = vmatprep.subr.bf16.mxu1 %v1404_v24  ;;  %v1466_v8 = vld [vmem:[%s2079_s1 + $0x100] ss:$8 sps:$4 sm:$0xff]   ;;  %v1476_v10 = vld [vmem:[%s2079_s1 + $0x114] ss:$8 sps:$4 sm:$0xff]   ;;  %v1474_v12 = vld [vmem:[%s2079_s1 + $0x110] ss:$8 sps:$4 sm:$0xff]  }
  0x19   :  { %927 = vmatprep.subr.bf16.mxu0 %v1406_v25  ;;  %v1471_v9 = vld [vmem:[%s2079_s1 + $0x300] ss:$8 sps:$4 sm:$0xff]   ;;  %v1479_v11 = vld [vmem:[%s2079_s1 + $0x314] ss:$8 sps:$4 sm:$0xff]   ;;  %v1477_v13 = vld [vmem:[%s2079_s1 + $0x310] ss:$8 sps:$4 sm:$0xff]  }
  0x1a   :  { %v1482_v14 = vld [vmem:[%s2079_s1 + $0x124] ss:$8 sps:$4 sm:$0xff]   ;;  %v1480_v16 = vld [vmem:[%s2079_s1 + $0x120] ss:$8 sps:$4 sm:$0xff]   ;;  %v1488_v18 = vld [vmem:[%s2079_s1 + $0x134] ss:$8 sps:$4 sm:$0xff]  }
  0x1b   :  { %846 = vmatpush1.bf16.msra.mxu1 %v1408_v26  ;;  %v1485_v15 = vld [vmem:[%s2079_s1 + $0x324] ss:$8 sps:$4 sm:$0xff]   ;;  %v1483_v17 = vld [vmem:[%s2079_s1 + $0x320] ss:$8 sps:$4 sm:$0xff]   ;;  %v1491_v19 = vld [vmem:[%s2079_s1 + $0x334] ss:$8 sps:$4 sm:$0xff]  }
  0x1c   :  { %928 = vmatpush1.bf16.msra.mxu0 %v1409_v27  ;;  %847 = vmatprep.subr.bf16.mxu1 %v1410_v28  ;;  %v1486_v20 = vld [vmem:[%s2079_s1 + $0x130] ss:$8 sps:$4 sm:$0xff]   ;;  %v1494_v22 = vld [vmem:[%s2079_s1 + $0x144] ss:$8 sps:$4 sm:$0xff]   ;;  %v1492_v24 = vld [vmem:[%s2079_s1 + $0x140] ss:$8 sps:$4 sm:$0xff]  }
  0x1d   :  { %929 = vmatprep.subr.bf16.mxu0 %v1412_v29  ;;  %v1489_v21 = vld [vmem:[%s2079_s1 + $0x330] ss:$8 sps:$4 sm:$0xff]   ;;  %v1497_v23 = vld [vmem:[%s2079_s1 + $0x344] ss:$8 sps:$4 sm:$0xff]   ;;  %v1495_v25 = vld [vmem:[%s2079_s1 + $0x340] ss:$8 sps:$4 sm:$0xff]  }
  0x1e   :  { %v1500_v26 = vld [vmem:[%s2079_s1 + $0x154] ss:$8 sps:$4 sm:$0xff]   ;;  %v1498_v28 = vld [vmem:[%s2079_s1 + $0x150] ss:$8 sps:$4 sm:$0xff]   ;;  %v1530_v50 = vld [vmem:[%s2079_s1 + $0x1a4] ss:$8 sps:$4 sm:$0xff]  }
  0x1f   :  { %848 = vmatpush1.bf16.msra.mxu1 %v1414_v30  ;;  %v1503_v27 = vld [vmem:[%s2079_s1 + $0x354] ss:$8 sps:$4 sm:$0xff]   ;;  %v1501_v29 = vld [vmem:[%s2079_s1 + $0x350] ss:$8 sps:$4 sm:$0xff]   ;;  %v1506_v30 = vld [vmem:[%s2079_s1 + $0x164] ss:$8 sps:$4 sm:$0xff]  }
  0x20   :  { %930 = vmatpush1.bf16.msra.mxu0 %v1415_v31  ;;  %849 = vmatprep.subr.bf16.mxu1 %v1416_v32  ;;  %v1509_v31 = vld [vmem:[%s2079_s1 + $0x364] ss:$8 sps:$4 sm:$0xff]   ;;  %v1504_v32 = vld [vmem:[%s2079_s1 + $0x160] ss:$8 sps:$4 sm:$0xff]   ;;  %v1524_v46 = vld [vmem:[%s2079_s1 + $0x194] ss:$8 sps:$4 sm:$0xff]  }
  0x21   :  { %931 = vmatprep.subr.bf16.mxu0 %v1418_v33  ;;  %v1896_v33 = vld [vmem:[%s2080_s0 + $0x8] sm:$0xff]  ;;  %v1522_v48 = vld [vmem:[%s2079_s1 + $0x190] ss:$8 sps:$4 sm:$0xff]  }
  0x22   :  { %v1531_v53 = vld [vmem:[%s2079_s1 + $0x3a0] ss:$8 sps:$4 sm:$0xff]  }
  0x23   :  { %850 = vmatpush1.bf16.msra.mxu1 %v1420_v34  ;;  %v1901_v34 = vld [vmem:[%s2080_s0 + $0x18] sm:$0xff] }
  0x24   :  { %932 = vmatpush1.bf16.msra.mxu0 %v1421_v35  ;;  %851 = vmatprep.subr.bf16.mxu1 %v1422_v36  ;;  %v1507_v35 = vld [vmem:[%s2079_s1 + $0x360] ss:$8 sps:$4 sm:$0xff]   ;;  %v1184_v36 = vcombine.high %v1896_v33, %v1896_v33 }
  0x25   :  { %933 = vmatprep.subr.bf16.mxu0 %v1424_v37  ;;  %v1188_v37 = vcombine.high %v1901_v34, %v1901_v34 }
  0x27   :  { %852 = vmatpush1.bf16.msra.mxu1 %v1426_v38  ;;  %v1512_v38 = vld [vmem:[%s2079_s1 + $0x174] ss:$8 sps:$4 sm:$0xff]  }
  0x28   :  { %934 = vmatpush1.bf16.msra.mxu0 %v1427_v39  ;;  %853 = vmatprep.subr.bf16.mxu1 %v1428_v40  ;;  %v1515_v39 = vld [vmem:[%s2079_s1 + $0x374] ss:$8 sps:$4 sm:$0xff]   ;;  %v1510_v40 = vld [vmem:[%s2079_s1 + $0x170] ss:$8 sps:$4 sm:$0xff]  }
  0x29   :  { %935 = vmatprep.subr.bf16.mxu0 %v1430_v41  ;;  %v1513_v41 = vld [vmem:[%s2079_s1 + $0x370] ss:$8 sps:$4 sm:$0xff]  }
  0x2b   :  { %854 = vmatpush1.bf16.msra.mxu1 %v1432_v42  ;;  %v1518_v42 = vld [vmem:[%s2079_s1 + $0x184] ss:$8 sps:$4 sm:$0xff]  }
  0x2c   :  { %936 = vmatpush1.bf16.msra.mxu0 %v1433_v43  ;;  %855 = vmatprep.subr.bf16.mxu1 %v1434_v44  ;;  %v1521_v43 = vld [vmem:[%s2079_s1 + $0x384] ss:$8 sps:$4 sm:$0xff]   ;;  %v1516_v44 = vld [vmem:[%s2079_s1 + $0x180] ss:$8 sps:$4 sm:$0xff]  }
  0x2d   :  { %937 = vmatprep.subr.bf16.mxu0 %v1436_v45  ;;  %v1519_v45 = vld [vmem:[%s2079_s1 + $0x380] ss:$8 sps:$4 sm:$0xff]  }
  0x2f   :  { %856 = vmatpush1.bf16.msra.mxu1 %v1438_v47  ;;  %v1527_v47 = vld [vmem:[%s2079_s1 + $0x394] ss:$8 sps:$4 sm:$0xff]  }
  0x30   :  { %938 = vmatpush1.bf16.msra.mxu0 %v1439_v49  ;;  %857 = vmatprep.subr.bf16.mxu1 %v1440_v51  ;;  %v1525_v49 = vld [vmem:[%s2079_s1 + $0x390] ss:$8 sps:$4 sm:$0xff]   ;;  %v1533_v51 = vld [vmem:[%s2079_s1 + $0x3a4] ss:$8 sps:$4 sm:$0xff]  }
  0x31   :  { %939 = vmatprep.subr.bf16.mxu0 %v1442_v52  ;;  %v1528_v52 = vld [vmem:[%s2079_s1 + $0x1a0] ss:$8 sps:$4 sm:$0xff]  }
  0x33   :  { %858 = vmatpush1.bf16.msra.mxu1 %v1444_v54  ;;  %v1536_v54 = vld [vmem:[%s2079_s1 + $0x1b4] ss:$8 sps:$4 sm:$0xff]  }
  0x34   :  { %940 = vmatpush1.bf16.msra.mxu0 %v1445_v55  ;;  %859 = vmatprep.subr.bf16.mxu1 %v1446_v56  ;;  %v1539_v55 = vld [vmem:[%s2079_s1 + $0x3b4] ss:$8 sps:$4 sm:$0xff]   ;;  %v1534_v56 = vld [vmem:[%s2079_s1 + $0x1b0] ss:$8 sps:$4 sm:$0xff]  }
  0x35   :  { %941 = vmatprep.subr.bf16.mxu0 %v1448_v57  ;;  %v1537_v57 = vld [vmem:[%s2079_s1 + $0x3b0] ss:$8 sps:$4 sm:$0xff]  }
  0x37   :  { %860 = vmatpush1.bf16.msra.mxu1 %v1450_v58  ;;  %v1542_v58 = vld [vmem:[%s2079_s1 + $0x1c4] ss:$8 sps:$4 sm:$0xff]  }
  0x38   :  { %942 = vmatpush1.bf16.msra.mxu0 %v1451_v59  ;;  %861 = vmatprep.subr.bf16.mxu1 %v1452_v60  ;;  %v1545_v59 = vld [vmem:[%s2079_s1 + $0x3c4] ss:$8 sps:$4 sm:$0xff]   ;;  %v1540_v60 = vld [vmem:[%s2079_s1 + $0x1c0] ss:$8 sps:$4 sm:$0xff]  }
  0x39   :  { %943 = vmatprep.subr.bf16.mxu0 %v1454_v61  ;;  %v1543_v61 = vld [vmem:[%s2079_s1 + $0x3c0] ss:$8 sps:$4 sm:$0xff]  }
  0x3b   :  { %862 = vmatpush1.bf16.msra.mxu1 %v1456_v62  ;;  %v1548_v62 = vld [vmem:[%s2079_s1 + $0x1d4] ss:$8 sps:$4 sm:$0xff]  }
  0x3c   :  { %944 = vmatpush1.bf16.msra.mxu0 %v1457_v63  ;;  %863 = vmatprep.subr.bf16.mxu1 %v1458_v0  ;;  %v1551_v63 = vld [vmem:[%s2079_s1 + $0x3d4] ss:$8 sps:$4 sm:$0xff]   ;;  %v1546_v0 = vld [vmem:[%s2079_s1 + $0x1d0] ss:$8 sps:$4 sm:$0xff]  }
  0x3d   :  { %945 = vmatprep.subr.bf16.mxu0 %v1460_v1  ;;  %v1549_v1 = vld [vmem:[%s2079_s1 + $0x3d0] ss:$8 sps:$4 sm:$0xff]  }
  0x3f   :  { %864 = vmatpush1.bf16.msra.mxu1 %v1462_v2  ;;  %v1554_v2 = vld [vmem:[%s2079_s1 + $0x1e4] ss:$8 sps:$4 sm:$0xff]  }
  0x40   :  { %946 = vmatpush1.bf16.msra.mxu0 %v1463_v3  ;;  %874 = vmatprep.subr.bf16.mxu1 %v1468_v4  ;;  %v1557_v3 = vld [vmem:[%s2079_s1 + $0x3e4] ss:$8 sps:$4 sm:$0xff]   ;;  %v1552_v4 = vld [vmem:[%s2079_s1 + $0x1e0] ss:$8 sps:$4 sm:$0xff]  }
  0x41   :  { %956 = vmatprep.subr.bf16.mxu0 %v1473_v5  ;;  %v1555_v5 = vld [vmem:[%s2079_s1 + $0x3e0] ss:$8 sps:$4 sm:$0xff]  }
  0x42   :  { %866 = vmatmul.mubr.bf16.vlgmr.msra.gmra.mrb[0].mxu1 %v1181_v6  ;;  %v1560_v6 = vld [vmem:[%s2079_s1 + $0x1f4] ss:$8 sps:$4 sm:$0xff]  }
  0x43   :  { %948 = vmatmul.mubr.bf16.vlgmr.msra.gmra.mrb[0].mxu0 %v1185_v7  ;;  %875 = vmatpush1.bf16.msra.mxu1 %v1466_v8  ;;  %v1563_v7 = vld [vmem:[%s2079_s1 + $0x3f4] ss:$8 sps:$4 sm:$0xff]   ;;  %v1558_v8 = vld [vmem:[%s2079_s1 + $0x1f0] ss:$8 sps:$4 sm:$0xff]  }
  0x44   :  { %957 = vmatpush1.bf16.msra.mxu0 %v1471_v9  ;;  %876 = vmatprep.subr.bf16.mxu1 %v1476_v10  ;;  %v1561_v9 = vld [vmem:[%s2079_s1 + $0x3f0] ss:$8 sps:$4 sm:$0xff]   ;;  %v1568_v10 = vld [vmem:[%s2081_s3 + $0x40] sm:$0xff]  }
  0x45   :  { %958 = vmatprep.subr.bf16.mxu0 %v1479_v11  ;;  %906 = vmatprep.mubr.bf16.mxu1 %v1184_v36  ;;  %v1183_v11 = vcombine.low %v1896_v33, %v1896_v33 }
  0x46   :  { %988 = vmatprep.mubr.bf16.mxu0 %v1188_v37 }
  0x47   :  { %877 = vmatpush1.bf16.msra.mxu1 %v1474_v12  ;;  %v1187_v12 = vcombine.low %v1901_v34, %v1901_v34 }
  0x48   :  { %959 = vmatpush1.bf16.msra.mxu0 %v1477_v13  ;;  %878 = vmatprep.subr.bf16.mxu1 %v1482_v14  ;;  %v1569_v13 = vld [vmem:[%s2081_s3] sm:$0xff]   ;;  %v1570_v14 = vld [vmem:[%s2081_s3 + $0x48] sm:$0xff]  }
  0x49   :  { %960 = vmatprep.subr.bf16.mxu0 %v1485_v15  ;;  %v1571_v15 = vld [vmem:[%s2081_s3 + $0x8] sm:$0xff]  }
  0x4b   :  { %879 = vmatpush1.bf16.msra.mxu1 %v1480_v16  ;;  %v1572_v16 = vld [vmem:[%s2081_s3 + $0x50] sm:$0xff]  }
  0x4c   :  { %961 = vmatpush1.bf16.msra.mxu0 %v1483_v17  ;;  %880 = vmatprep.subr.bf16.mxu1 %v1488_v18  ;;  %v1573_v17 = vld [vmem:[%s2081_s3 + $0x10] sm:$0xff]   ;;  %v1574_v18 = vld [vmem:[%s2081_s3 + $0x58] sm:$0xff]  }
  0x4d   :  { %962 = vmatprep.subr.bf16.mxu0 %v1491_v19  ;;  %v1575_v19 = vld [vmem:[%s2081_s3 + $0x18] sm:$0xff]  }
  0x4f   :  { %881 = vmatpush1.bf16.msra.mxu1 %v1486_v20  ;;  %v1576_v20 = vld [vmem:[%s2081_s3 + $0x60] sm:$0xff]  }
  0x50   :  { %963 = vmatpush1.bf16.msra.mxu0 %v1489_v21  ;;  %882 = vmatprep.subr.bf16.mxu1 %v1494_v22  ;;  %v1577_v21 = vld [vmem:[%s2081_s3 + $0x20] sm:$0xff]   ;;  %v1578_v22 = vld [vmem:[%s2081_s3 + $0x68] sm:$0xff]  }
  0x51   :  { %964 = vmatprep.subr.bf16.mxu0 %v1497_v23  ;;  %v1579_v23 = vld [vmem:[%s2081_s3 + $0x28] sm:$0xff]  }
  0x53   :  { %883 = vmatpush1.bf16.msra.mxu1 %v1492_v24  ;;  %v1580_v24 = vld [vmem:[%s2081_s3 + $0x70] sm:$0xff]  }
  0x54   :  { %965 = vmatpush1.bf16.msra.mxu0 %v1495_v25  ;;  %884 = vmatprep.subr.bf16.mxu1 %v1500_v26  ;;  %v1581_v25 = vld [vmem:[%s2081_s3 + $0x30] sm:$0xff]   ;;  %v1582_v26 = vld [vmem:[%s2081_s3 + $0x78] sm:$0xff]  }
  0x55   :  { %966 = vmatprep.subr.bf16.mxu0 %v1503_v27  ;;  %v1583_v27 = vld [vmem:[%s2081_s3 + $0x38] sm:$0xff]  }
  0x57   :  { %885 = vmatpush1.bf16.msra.mxu1 %v1498_v28  ;;  %v155_v28 = vlaneseq }
  0x58   :  { %967 = vmatpush1.bf16.msra.mxu0 %v1501_v29  ;;  %886 = vmatprep.subr.bf16.mxu1 %v1506_v30 }
  0x59   :  { %968 = vmatprep.subr.bf16.mxu0 %v1509_v31  ;;  %v156_v29 = vshrl.u32 %v155_v28, 7  ;;  %v153_v31 = vld [vmem:[%s2082_s2] sm:$0x3] }
  0x5b   :  { %887 = vmatpush1.bf16.msra.mxu1 %v1504_v32  ;;  %v157_v30 = vsub.s32 0, %v156_v29  ;;  %v161_v32 = vsub.s32 1, %v156_v29 }
  0x5c   :  { %969 = vmatpush1.bf16.msra.mxu0 %v1507_v35  ;;  %888 = vmatprep.subr.bf16.mxu1 %v1512_v38 }
  0x5d   :  { %970 = vmatprep.subr.bf16.mxu0 %v1515_v39  ;;  %v158_v33 = vrot.slane %v153_v31, %v157_v30  ;;  %v162_v34 = vrot.slane %v153_v31, %v161_v32 }
  0x5f   :  { %889 = vmatpush1.bf16.msra.mxu1 %v1510_v40 }
  0x60   :  { %971 = vmatpush1.bf16.msra.mxu0 %v1513_v41  ;;  %890 = vmatprep.subr.bf16.mxu1 %v1518_v42 }
  0x61   :  { %972 = vmatprep.subr.bf16.mxu0 %v1521_v43 }
  0x63   :  { %891 = vmatpush1.bf16.msra.mxu1 %v1516_v44 }
  0x64   :  { %973 = vmatpush1.bf16.msra.mxu0 %v1519_v45  ;;  %892 = vmatprep.subr.bf16.mxu1 %v1524_v46 }
  0x65   :  { %974 = vmatprep.subr.bf16.mxu0 %v1527_v47 }
  0x67   :  { %893 = vmatpush1.bf16.msra.mxu1 %v1522_v48 }
  0x68   :  { %975 = vmatpush1.bf16.msra.mxu0 %v1525_v49  ;;  %894 = vmatprep.subr.bf16.mxu1 %v1530_v50 }
  0x69   :  { %976 = vmatprep.subr.bf16.mxu0 %v1533_v51 }
  0x6b   :  { %895 = vmatpush1.bf16.msra.mxu1 %v1528_v52  ;;  %v1317_v52 = vld [vmem:[%s2083_s4] ss:$0 sm:$0xff] }
  0x6c   :  { %977 = vmatpush1.bf16.msra.mxu0 %v1531_v53  ;;  %896 = vmatprep.subr.bf16.mxu1 %v1536_v54 }
  0x6d   :  { %978 = vmatprep.subr.bf16.mxu0 %v1539_v55 }
  0x6f   :  { %897 = vmatpush1.bf16.msra.mxu1 %v1534_v56 }
  0x70   :  { %979 = vmatpush1.bf16.msra.mxu0 %v1537_v57  ;;  %898 = vmatprep.subr.bf16.mxu1 %v1542_v58 }
  0x71   :  { %980 = vmatprep.subr.bf16.mxu0 %v1545_v59 }
  0x73   :  { %899 = vmatpush1.bf16.msra.mxu1 %v1540_v60 }
  0x74   :  { %981 = vmatpush1.bf16.msra.mxu0 %v1543_v61  ;;  %900 = vmatprep.subr.bf16.mxu1 %v1548_v62 }
  0x75   :  { %982 = vmatprep.subr.bf16.mxu0 %v1551_v63 }
  0x77   :  { %901 = vmatpush1.bf16.msra.mxu1 %v1546_v0 }
  0x78   :  { %983 = vmatpush1.bf16.msra.mxu0 %v1549_v1  ;;  %902 = vmatprep.subr.bf16.mxu1 %v1554_v2 }
  0x79   :  { %984 = vmatprep.subr.bf16.mxu0 %v1557_v3 }
  0x7b   :  { %903 = vmatpush1.bf16.msra.mxu1 %v1552_v4 }
  0x7c   :  { %985 = vmatpush1.bf16.msra.mxu0 %v1555_v5  ;;  %904 = vmatprep.subr.bf16.mxu1 %v1560_v6 }
  0x7d   :  { %986 = vmatprep.subr.bf16.mxu0 %v1563_v7 }
  0x7f   :  { %905 = vmatpush1.bf16.msra.mxu1 %v1558_v8 }
  0x80   :  { %987 = vmatpush1.bf16.msra.mxu0 %v1561_v9  ;;  %1334 = vmatprep.subr.bf16.mxu1 %v1568_v10 }
  0x82   :  { %907 = vmatmul.mubr.bf16.vlgmr.msra.gmra.mrb[0].mxu1 %v1183_v11 }
  0x83   :  { %989 = vmatmul.mubr.bf16.vlgmr.msra.gmra.mrb[0].mxu0 %v1187_v12  ;;  %1335 = vmatpush3.bf16.msra.mxu1 %v1569_v13 }
  0x84   :  { %1336 = vmatprep.subr.bf16.mxu1 %v1570_v14 }
  0x87   :  { %1337 = vmatpush3.bf16.msra.mxu1 %v1571_v15 }
  0x88   :  { %1338 = vmatprep.subr.bf16.mxu1 %v1572_v16 }
  0x8b   :  { %1339 = vmatpush3.bf16.msra.mxu1 %v1573_v17 }
  0x8c   :  { %1340 = vmatprep.subr.bf16.mxu1 %v1574_v18 }
  0x8f   :  { %1341 = vmatpush3.bf16.msra.mxu1 %v1575_v19 }
  0x90   :  { %1342 = vmatprep.subr.bf16.mxu1 %v1576_v20 }
  0x93   :  { %1343 = vmatpush3.bf16.msra.mxu1 %v1577_v21 }
  0x94   :  { %1344 = vmatprep.subr.bf16.mxu1 %v1578_v22 }
  0x97   :  { %1345 = vmatpush3.bf16.msra.mxu1 %v1579_v23 }
  0x98   :  { %1346 = vmatprep.subr.bf16.mxu1 %v1580_v24 }
  0x9b   :  { %1347 = vmatpush3.bf16.msra.mxu1 %v1581_v25 }
  0x9c   :  { %1348 = vmatprep.subr.bf16.mxu1 %v1582_v26 }
  0x9f   :  { %1349 = vmatpush3.bf16.msra.mxu1 %v1583_v27 }
 0x155   :  { %v908_v35 = vpop.f32.mrb[0].mxu1 }
 0x156   :  { %v990_v36 = vpop.f32.mrb[0].mxu0  ;;  %v1356_v37 = vadd.f32 %v908_v35, %v158_v33  ;;  %v910_v38 = vpop.f32.mrb[1].mxu1 }
 0x157   :  { %v992_v39 = vpop.f32.mrb[1].mxu0  ;;  %v1358_v40 = vadd.f32 %v910_v38, %v162_v34  ;;  %v912_v41 = vpop.f32.mrb[2].mxu1 }
 0x158   :  { %v994_v42 = vpop.f32.mrb[2].mxu0  ;;  %v1357_v43 = vadd.f32 %v1356_v37, %v990_v36  ;;  %v913_v44 = vpop.f32.mrb[3].mxu1 }
 0x159   :  { %v995_v45 = vpop.f32.mrb[3].mxu0  ;;  %v1359_v46 = vadd.f32 %v1358_v40, %v992_v39 }
 0x15a   :  { %v997_v47 = vmax.f32 %v1357_v43, 0.0 }
 0x15b   :  { %v998_v48 = vmax.f32 %v1359_v46, 0.0 }
 0x15c   :  { %v999_v50 = vpack.c.bf16 %v997_v47, %v997_v47 }
 0x15d   :  { %v1000_v49 = vpack.c.bf16 %v998_v48, %v998_v48 }
 0x15f   :  { %1168 = vmatprep.mubr.bf16.mxu1 %v1000_v49 }
 0x160   :  { %1169 = vmatmul.mubr.bf16.vlgmr.msra.gmra.mrb[4].mxu1 %v999_v50 }
 0x233   :  { %v1350_v51 = vpop.f32.mrb[4].mxu1 }
 0x234   :  { %v1351_v53 = vpop.f32.mrb[5].mxu1 }
 0x235   :  { %v1352_v54 = vadd.f32 %v1351_v53, %v1350_v51  ;;  %v1353_v55 = vpop.f32.mrb[6].mxu1 }
 0x236   :  { %v1354_v56 = vpop.f32.mrb[7].mxu1 }
 0x237   :  { %v1171_v57 = vadd.f32 %v1352_v54, %v1317_v52 }
 0x239   :  { %1176 = vst [vmem:[%s2084_s5] sm:$0xff] %v1171_v57 }

</bundles_post_ra>
